<compile_context>
chip_gen: v6e
topology: v6e:2x2x1
jax: 0.10.0
libtpu: 0.0.40
codegen_flags: <defaults>
</compile_context>

<pallas_src>
import functools
import math

import jax
import jax.numpy as jnp
from jax.experimental import pallas as pl
from jax.experimental.pallas import tpu as pltpu

# Raised scoped-VMEM limit (defaults are 16-32 MiB).  64 MiB is within physical
# VMEM on v5e/v6e (128 MiB) and v7x (64 MiB); tiles below are budgeted well
# under it, so v7x's smaller VMEM is still fine.
_VMEM_LIMIT_BYTES = 64 * 1024 * 1024

# Finite large-negative mask fill: keeps max/exp NaN-free even if a whole row
# of a diagonal-straddling kv tile is masked.
_MASK_VALUE = -1e30


def _fit_tile(dim: int, preferred: int) -> int:
    """Largest tile <= `preferred` (a multiple of 128) that evenly divides `dim`.

    Falls back to the full dimension, which always satisfies the TPU (8, 128)
    block-shape rule.
    """
    if dim <= preferred:
        return dim
    t = preferred
    while t >= 128:
        if dim % t == 0:
            return t
        t -= 128
    return dim


# ---------------------------------------------------------------------------
# LayerNorm kernel (row-tiled, f32 math).
# ---------------------------------------------------------------------------
def _layernorm_kernel(x_ref, g_ref, b_ref, o_ref, *, eps):
    x = x_ref[...].astype(jnp.float32)
    mu = jnp.mean(x, axis=-1, keepdims=True)
    xc = x - mu
    var = jnp.mean(xc * xc, axis=-1, keepdims=True)
    y = xc * jax.lax.rsqrt(var + eps)
    y = y * g_ref[...].astype(jnp.float32) + b_ref[...].astype(jnp.float32)
    o_ref[...] = y.astype(o_ref.dtype)


def layernorm_pallas(x, gamma, beta, *, eps=1e-5, block_rows=256):
    R, D = x.shape
    tr = _fit_tile(R, block_rows)
    return pl.pallas_call(
        functools.partial(_layernorm_kernel, eps=eps),
        out_shape=jax.ShapeDtypeStruct((R, D), x.dtype),
        grid=(R // tr,),
        in_specs=[
            pl.BlockSpec((tr, D), lambda i: (i, 0)),
            pl.BlockSpec((1, D), lambda i: (0, 0)),
            pl.BlockSpec((1, D), lambda i: (0, 0)),
        ],
        out_specs=pl.BlockSpec((tr, D), lambda i: (i, 0)),
        compiler_params=pltpu.CompilerParams(
            dimension_semantics=("parallel",),
            vmem_limit_bytes=_VMEM_LIMIT_BYTES),
    )(x, gamma.reshape(1, D), beta.reshape(1, D))


# ---------------------------------------------------------------------------
# Generic tiled matmul kernel with fused bias / GELU / residual epilogue.
# MXU inputs cast to `compute_dtype` (bf16 by default), accumulation in f32.
# ---------------------------------------------------------------------------
def _linear_kernel(*refs, has_bias, has_residual, activation, compute_dtype):
    it = iter(refs)
    x_ref = next(it)
    w_ref = next(it)
    b_ref = next(it) if has_bias else None
    r_ref = next(it) if has_residual else None
    o_ref = next(it)
    acc_ref = next(it)

    k = pl.program_id(2)

    @pl.when(k == 0)
    def _():
        acc_ref[...] = jnp.zeros(acc_ref.shape, acc_ref.dtype)

    acc_ref[...] += jnp.dot(
        x_ref[...].astype(compute_dtype),
        w_ref[...].astype(compute_dtype),
        preferred_element_type=jnp.float32)

    @pl.when(k == pl.num_programs(2) - 1)
    def _():
        y = acc_ref[...]
        if has_bias:
            y = y + b_ref[...].astype(jnp.float32)
        if activation == "gelu":
            y = jax.nn.gelu(y)  # tanh approximation (matches the reference)
        if has_residual:
            y = y + r_ref[...].astype(jnp.float32)
        o_ref[...] = y.astype(o_ref.dtype)


def linear_pallas(x, w, *, bias=None, residual=None, activation=None,
                  compute_dtype=jnp.bfloat16, out_dtype=None,
                  bm=256, bn=256, bk=512):
    M, K = x.shape
    Kw, N = w.shape
    assert K == Kw
    out_dtype = out_dtype or x.dtype
    tm = _fit_tile(M, bm)
    tn = _fit_tile(N, bn)  # lane-dense: multiple of 128 or the full width
    tk = _fit_tile(K, bk)

    in_specs = [
        pl.BlockSpec((tm, tk), lambda i, j, k: (i, k)),
        pl.BlockSpec((tk, tn), lambda i, j, k: (k, j)),
    ]
    operands = [x, w]
    if bias is not None:
        in_specs.append(pl.BlockSpec((1, tn), lambda i, j, k: (0, j)))
        operands.append(bias.reshape(1, N))
    if residual is not None:
        assert residual.shape == (M, N)
        in_specs.append(pl.BlockSpec((tm, tn), lambda i, j, k: (i, j)))
        operands.append(residual)

    kernel = functools.partial(
        _linear_kernel,
        has_bias=bias is not None,
        has_residual=residual is not None,
        activation=activation,
        compute_dtype=compute_dtype)

    return pl.pallas_call(
        kernel,
        out_shape=jax.ShapeDtypeStruct((M, N), out_dtype),
        grid=(M // tm, N // tn, K // tk),
        in_specs=in_specs,
        out_specs=pl.BlockSpec((tm, tn), lambda i, j, k: (i, j)),
        scratch_shapes=[pltpu.VMEM((tm, tn), jnp.float32)],
        compiler_params=pltpu.CompilerParams(
            dimension_semantics=("parallel", "parallel", "arbitrary"),
            vmem_limit_bytes=_VMEM_LIMIT_BYTES),
    )(*operands)


# ---------------------------------------------------------------------------
# Flash-attention kernel: grid = (batch*heads, q-tiles, kv-tiles).
# Online softmax state in VMEM scratch; never materialises the (N, N) scores.
# ---------------------------------------------------------------------------
def _flash_attn_kernel(q_ref, k_ref, v_ref, o_ref, m_sc, l_sc, acc_sc,
                       *, sm_scale, causal, compute_dtype):
    qi = pl.program_id(1)
    ki = pl.program_id(2)
    tq = q_ref.shape[0]
    tkv = k_ref.shape[0]

    @pl.when(ki == 0)
    def _():
        m_sc[...] = jnp.full(m_sc.shape, -jnp.inf, dtype=m_sc.dtype)
        l_sc[...] = jnp.zeros(l_sc.shape, l_sc.dtype)
        acc_sc[...] = jnp.zeros(acc_sc.shape, acc_sc.dtype)

    def compute_block():
        q = (q_ref[...].astype(jnp.float32) * sm_scale).astype(compute_dtype)
        k = k_ref[...].astype(compute_dtype)
        # Contract head dims directly: no k.T -> no XLU transpose per tile.
        s = jax.lax.dot_general(
            q, k, dimension_numbers=(((1,), (1,)), ((), ())),
            preferred_element_type=jnp.float32)            # (tq, tkv), f32
        if causal:
            row = qi * tq + jax.lax.broadcasted_iota(jnp.int32, (tq, tkv), 0)
            col = ki * tkv + jax.lax.broadcasted_iota(jnp.int32, (tq, tkv), 1)
            s = jnp.where(col > row, _MASK_VALUE, s)

        m_prev = m_sc[...]
        m_new = jnp.maximum(m_prev, jnp.max(s, axis=-1, keepdims=True))
        alpha = jnp.exp(m_prev - m_new)
        p = jnp.exp(s - m_new)
        l_sc[...] = alpha * l_sc[...] + jnp.sum(p, axis=-1, keepdims=True)
        acc_sc[...] = alpha * acc_sc[...] + jnp.dot(
            p.astype(compute_dtype), v_ref[...].astype(compute_dtype),
            preferred_element_type=jnp.float32)
        m_sc[...] = m_new

    if causal:
        # Skip kv tiles that lie entirely above the diagonal (fully masked):
        # roughly halves MXU/EUP work for causal attention.
        pl.when(ki * tkv <= qi * tq + (tq - 1))(compute_block)
    else:
        compute_block()

    @pl.when(ki == pl.num_programs(2) - 1)
    def _():
        inv_l = pl.reciprocal(l_sc[...], approx=True)   # EUP slot, not a divide
        o_ref[...] = (acc_sc[...] * inv_l).astype(o_ref.dtype)


def flash_attention_pallas(q, k, v, *, sm_scale, causal=True,
                           compute_dtype=jnp.bfloat16, bq=256, bkv=512):
    """q, k, v: (batch*heads, seq, dim_head) -> (batch*heads, seq, dim_head)."""
    BH, N, Dh = q.shape
    assert k.shape == (BH, N, Dh) and v.shape == (BH, N, Dh)
    tq = _fit_tile(N, bq)
    tkv = _fit_tile(N, bkv)
    num_q = N // tq
    num_kv = N // tkv

    q_spec = pl.BlockSpec((pl.Squeezed(), tq, Dh), lambda bh, qi, ki: (bh, qi, 0))
    o_spec = pl.BlockSpec((pl.Squeezed(), tq, Dh), lambda bh, qi, ki: (bh, qi, 0))

    def kv_spec():
        idx = lambda bh, qi, ki: (bh, ki, 0)
        if num_kv >= 3:
            # Deepen K/V pipelining when there are enough kv steps to overlap.
            return pl.BlockSpec((pl.Squeezed(), tkv, Dh), idx,
                                pipeline_mode=pl.Buffered(3))
        return pl.BlockSpec((pl.Squeezed(), tkv, Dh), idx)

    kernel = functools.partial(
        _flash_attn_kernel, sm_scale=sm_scale, causal=causal,
        compute_dtype=compute_dtype)

    return pl.pallas_call(
        kernel,
        out_shape=jax.ShapeDtypeStruct((BH, N, Dh), q.dtype),
        grid=(BH, num_q, num_kv),
        in_specs=[q_spec, kv_spec(), kv_spec()],
        out_specs=o_spec,
        scratch_shapes=[
            pltpu.VMEM((tq, 1), jnp.float32),    # running max m
            pltpu.VMEM((tq, 1), jnp.float32),    # running sum l
            pltpu.VMEM((tq, Dh), jnp.float32),   # output accumulator
        ],
        compiler_params=pltpu.CompilerParams(
            # Two parallel axes (batch*heads, q-tiles) -> both v7x TensorCores
            # get work even for tiny batch; kv (reduction) axis last/arbitrary.
            dimension_semantics=("parallel", "parallel", "arbitrary"),
            vmem_limit_bytes=_VMEM_LIMIT_BYTES),
    )(q, k, v)


# ---------------------------------------------------------------------------
# Full SimpleTransformer forward built from the kernels above.
# ---------------------------------------------------------------------------
@functools.partial(jax.jit,
                   static_argnames=("heads", "dim_head", "causal", "compute_dtype"))
def transformer_forward_pallas(params, ids, *, heads, dim_head, causal=True,
                               compute_dtype=jnp.bfloat16):
    B, N = ids.shape
    dim = params["tok"].shape[1]
    inner = heads * dim_head

    # TODO(synk): token-embedding gather + positional add stay in XLA (trivially memory-bound); all downstream compute runs in Pallas kernels.
    x = jnp.take(params["tok"], ids, axis=0) + params["pos"][:N][None]
    x2 = x.reshape(B * N, dim)

    def to_heads(t):  # (B*N, inner) -> (B*heads, N, dim_head); wrapper-side layout plumbing
        return t.reshape(B, N, heads, dim_head).transpose(0, 2, 1, 3).reshape(
            B * heads, N, dim_head)

    for blk in params["blocks"]:
        # --- attention sublayer (pre-LN, residual) ---
        h = layernorm_pallas(x2, blk["attn_ln"][0], blk["attn_ln"][1])
        wqkv = jnp.concatenate([blk["wq"], blk["wk"], blk["wv"]], axis=1)
        qkv = linear_pallas(h, wqkv, compute_dtype=compute_dtype)     # fused QKV proj
        q, k, v = jnp.split(qkv, 3, axis=-1)
        o = flash_attention_pallas(
            to_heads(q), to_heads(k), to_heads(v),
            sm_scale=dim_head ** (-0.5), causal=causal,
            compute_dtype=compute_dtype)
        o = o.reshape(B, heads, N, dim_head).transpose(0, 2, 1, 3).reshape(B * N, inner)
        x2 = linear_pallas(o, blk["wo"], residual=x2,
                           compute_dtype=compute_dtype)               # out proj + residual

        # --- feed-forward sublayer (pre-LN, residual) ---
        h = layernorm_pallas(x2, blk["ff_ln"][0], blk["ff_ln"][1])
        h = linear_pallas(h, blk["w1"], bias=blk["b1"], activation="gelu",
                          compute_dtype=compute_dtype)
        x2 = linear_pallas(h, blk["w2"], bias=blk["b2"], residual=x2,
                           compute_dtype=compute_dtype)

    x2 = layernorm_pallas(x2, params["final_ln"][0], params["final_ln"][1])
    logits = linear_pallas(x2, params["logits"], compute_dtype=compute_dtype)
    return logits.reshape(B, N, -1)


# ---------------------------------------------------------------------------
# Pure-JAX reference mirroring the PyTorch forward (eval mode, dropout = id).
# ---------------------------------------------------------------------------
def _ref_layernorm(x, g, b, eps=1e-5):
    mu = jnp.mean(x, axis=-1, keepdims=True)
    xc = x - mu
    var = jnp.mean(xc * xc, axis=-1, keepdims=True)
    return xc * jax.lax.rsqrt(var + eps) * g + b


def _ref_attention(x, wq, wk, wv, wo, *, heads, dim_head, causal=True):
    B, N, _ = x.shape
    hp = jax.lax.Precision.HIGHEST
    scale = dim_head ** (-0.5)
    q = jnp.dot(x, wq, precision=hp)
    k = jnp.dot(x, wk, precision=hp)
    v = jnp.dot(x, wv, precision=hp)

    def split(t):  # 'b n (h d) -> b h n d'
        return t.reshape(B, N, heads, dim_head).transpose(0, 2, 1, 3)

    q, k, v = split(q), split(k), split(v)
    dots = jnp.einsum("bhnd,bhmd->bhnm", q, k, precision=hp) * scale
    if causal:
        mask = jnp.triu(jnp.ones((N, N), dtype=bool), 1)
        dots = jnp.where(mask, -jnp.inf, dots)
    attn = jax.nn.softmax(dots, axis=-1)
    out = jnp.einsum("bhnm,bhmd->bhnd", attn, v, precision=hp)
    out = out.transpose(0, 2, 1, 3).reshape(B, N, heads * dim_head)
    return jnp.dot(out, wo, precision=hp)


def transformer_reference(params, ids, *, heads, dim_head, causal=True):
    B, N = ids.shape
    hp = jax.lax.Precision.HIGHEST
    x = jnp.take(params["tok"], ids, axis=0) + params["pos"][:N][None]
    for blk in params["blocks"]:
        a = _ref_layernorm(x, blk["attn_ln"][0], blk["attn_ln"][1])
        x = x + _ref_attention(a, blk["wq"], blk["wk"], blk["wv"], blk["wo"],
                               heads=heads, dim_head=dim_head, causal=causal)
        f = _ref_layernorm(x, blk["ff_ln"][0], blk["ff_ln"][1])
        h = jax.nn.gelu(jnp.dot(f, blk["w1"], precision=hp) + blk["b1"])
        x = x + jnp.dot(h, blk["w2"], precision=hp) + blk["b2"]
    x = _ref_layernorm(x, params["final_ln"][0], params["final_ln"][1])
    return jnp.dot(x, params["logits"], precision=hp)


# ---------------------------------------------------------------------------
# Deterministic synthetic parameters.
# ---------------------------------------------------------------------------
def init_params(key, *, num_tokens, dim, depth, heads, dim_head, ff_mult,
                max_seq=1024):
    inner = heads * dim_head
    hidden = dim * ff_mult
    kit = iter(jax.random.split(key, 64))

    def lin(fan_in, fan_out):
        return jax.random.normal(next(kit), (fan_in, fan_out),
                                 jnp.float32) / math.sqrt(fan_in)

    def ln(d):
        kg, kb = jax.random.split(next(kit))
        return (1.0 + 0.1 * jax.random.normal(kg, (d,), jnp.float32),
                0.1 * jax.random.normal(kb, (d,), jnp.float32))

    params = {
        "tok": 0.02 * jax.random.normal(next(kit), (num_tokens, dim), jnp.float32),
        "pos": 0.02 * jax.random.normal(next(kit), (max_seq, dim), jnp.float32),
        "blocks": [],
    }
    for _ in range(depth):
        params["blocks"].append({
            "attn_ln": ln(dim),
            "wq": lin(dim, inner),
            "wk": lin(dim, inner),
            "wv": lin(dim, inner),
            "wo": lin(inner, dim),
            "ff_ln": ln(dim),
            "w1": lin(dim, hidden),
            "b1": 0.1 * jax.random.normal(next(kit), (hidden,), jnp.float32),
            "w2": lin(hidden, dim),
            "b2": 0.1 * jax.random.normal(next(kit), (dim,), jnp.float32),
        })
    params["final_ln"] = ln(dim)
    params["logits"] = lin(dim, num_tokens)
    return params


if __name__ == "__main__":
    # Small config consistent with SimpleTransformer (kept tiny for the demo).
    num_tokens, dim, depth = 256, 32, 2
    heads, dim_head, ff_mult = 4, 16, 4
    B, N = 2, 8

    root = jax.random.PRNGKey(0)
    k_params, k_ids = jax.random.split(root)
    params = init_params(k_params, num_tokens=num_tokens, dim=dim, depth=depth,
                         heads=heads, dim_head=dim_head, ff_mult=ff_mult)
    ids = jax.random.randint(k_ids, (B, N), 0, num_tokens, dtype=jnp.int32)

    ref = transformer_reference(params, ids, heads=heads, dim_head=dim_head)

    # f32 MXU path: tight correctness check against the pure-JAX reference.
    out_f32 = transformer_forward_pallas(params, ids, heads=heads,
                                         dim_head=dim_head,
                                         compute_dtype=jnp.float32)
    out_f32 = jax.block_until_ready(out_f32)
    assert out_f32.shape == (B, N, num_tokens)
    assert jnp.allclose(out_f32, ref, atol=2e-2, rtol=2e-2), "f32 path mismatch"

    # bf16 MXU path (fast path per perf guidance): looser tolerance.
    out_bf16 = transformer_forward_pallas(params, ids, heads=heads,
                                          dim_head=dim_head,
                                          compute_dtype=jnp.bfloat16)
    out_bf16 = jax.block_until_ready(out_bf16)
    assert out_bf16.shape == (B, N, num_tokens)
    assert jnp.allclose(out_bf16, ref, atol=1e-1, rtol=1e-1), "bf16 path mismatch"

    print("KERNEL_OK")
</pallas_src>

<mosaic_0001>
module attributes {stable_mosaic.version = 11 : i64} {
  func.func @_layernorm_kernel(%arg0: i32, %arg1: memref<16x32xf32, #tpu.memory_space<vmem>>, %arg2: memref<1x32xf32, #tpu.memory_space<vmem>>, %arg3: memref<1x32xf32, #tpu.memory_space<vmem>>, %arg4: memref<16x32xf32, #tpu.memory_space<vmem>>) attributes {dimension_semantics = [#tpu.dimension_semantics<parallel>], iteration_bounds = array<i64: 1>, scalar_prefetch = 0 : i64, scratch_operands = 0 : i64, tpu.core_type = #tpu.core_type<tc>, window_params = [{transform_indices = @transform_0, window_bounds = array<i64: 16, 32>}, {pipeline_mode = #tpu.pipeline_mode<synchronous>, transform_indices = @transform_1, window_bounds = array<i64: 1, 32>}, {pipeline_mode = #tpu.pipeline_mode<synchronous>, transform_indices = @transform_2, window_bounds = array<i64: 1, 32>}, {transform_indices = @transform_3, window_bounds = array<i64: 16, 32>}]} {
    %c0 = arith.constant 0 : index
    %c0_0 = arith.constant 0 : index
    %0 = vector.load %arg1[%c0, %c0_0] : memref<16x32xf32, #tpu.memory_space<vmem>>, vector<16x32xf32>
    %cst = arith.constant dense<0.000000e+00> : vector<16xf32>
    %1 = vector.multi_reduction <add>, %0, %cst [1] : vector<16x32xf32> to vector<16xf32>
    %2 = vector.shape_cast %1 : vector<16xf32> to vector<16x1xf32>
    %cst_1 = arith.constant 3.200000e+01 : f32
    %3 = vector.broadcast %cst_1 : f32 to vector<16x1xf32>
    %4 = arith.divf %2, %3 : vector<16x1xf32>
    %5 = vector.broadcast %4 : vector<16x1xf32> to vector<16x32xf32>
    %6 = arith.subf %0, %5 : vector<16x32xf32>
    %7 = arith.mulf %6, %6 : vector<16x32xf32>
    %cst_2 = arith.constant dense<0.000000e+00> : vector<16xf32>
    %8 = vector.multi_reduction <add>, %7, %cst_2 [1] : vector<16x32xf32> to vector<16xf32>
    %9 = vector.shape_cast %8 : vector<16xf32> to vector<16x1xf32>
    %cst_3 = arith.constant 3.200000e+01 : f32
    %10 = vector.broadcast %cst_3 : f32 to vector<16x1xf32>
    %11 = arith.divf %9, %10 : vector<16x1xf32>
    %cst_4 = arith.constant 9.99999974E-6 : f32
    %12 = vector.broadcast %cst_4 : f32 to vector<16x1xf32>
    %13 = arith.addf %11, %12 : vector<16x1xf32>
    %14 = math.rsqrt %13 : vector<16x1xf32>
    %15 = vector.broadcast %14 : vector<16x1xf32> to vector<16x32xf32>
    %16 = arith.mulf %6, %15 : vector<16x32xf32>
    %c0_5 = arith.constant 0 : index
    %c0_6 = arith.constant 0 : index
    %17 = vector.load %arg2[%c0_5, %c0_6] : memref<1x32xf32, #tpu.memory_space<vmem>>, vector<1x32xf32>
    %18 = vector.broadcast %17 : vector<1x32xf32> to vector<16x32xf32>
    %19 = arith.mulf %16, %18 : vector<16x32xf32>
    %c0_7 = arith.constant 0 : index
    %c0_8 = arith.constant 0 : index
    %20 = vector.load %arg3[%c0_7, %c0_8] : memref<1x32xf32, #tpu.memory_space<vmem>>, vector<1x32xf32>
    %21 = vector.broadcast %20 : vector<1x32xf32> to vector<16x32xf32>
    %22 = arith.addf %19, %21 : vector<16x32xf32>
    %c0_9 = arith.constant 0 : index
    %c0_10 = arith.constant 0 : index
    %23 = vector.load %arg4[%c0_9, %c0_10] : memref<16x32xf32, #tpu.memory_space<vmem>>, vector<16x32xf32>
    tpu.vector_store %arg4[%c0_9, %c0_10], %22 {strides = array<i32>} : memref<16x32xf32, #tpu.memory_space<vmem>>, vector<16x32xf32>,
    return
  }
  func.func @transform_0(%arg0: i32) -> (i32, i32) {
    %c0_i32 = arith.constant 0 : i32
    %c0_i32_0 = arith.constant 0 : i32
    return %arg0, %c0_i32 : i32, i32
  }
  func.func @transform_1(%arg0: i32) -> (i32, i32) {
    %c0_i32 = arith.constant 0 : i32
    %c0_i32_0 = arith.constant 0 : i32
    %c0_i32_1 = arith.constant 0 : i32
    return %c0_i32, %c0_i32_0 : i32, i32
  }
  func.func @transform_2(%arg0: i32) -> (i32, i32) {
    %c0_i32 = arith.constant 0 : i32
    %c0_i32_0 = arith.constant 0 : i32
    %c0_i32_1 = arith.constant 0 : i32
    return %c0_i32, %c0_i32_0 : i32, i32
  }
  func.func @transform_3(%arg0: i32) -> (i32, i32) {
    %c0_i32 = arith.constant 0 : i32
    %c0_i32_0 = arith.constant 0 : i32
    return %arg0, %c0_i32 : i32, i32
  }
}

module attributes {stable_mosaic.version = 11 : i64} {
  func.func @_linear_kernel(%arg0: i32, %arg1: i32, %arg2: i32, %arg3: memref<16x32xf32, #tpu.memory_space<vmem>>, %arg4: memref<32x192xf32, #tpu.memory_space<vmem>>, %arg5: memref<16x192xf32, #tpu.memory_space<vmem>>, %arg6: memref<16x192xf32, #tpu.memory_space<vmem>>) attributes {dimension_semantics = [#tpu.dimension_semantics<parallel>, #tpu.dimension_semantics<parallel>, #tpu.dimension_semantics<arbitrary>], iteration_bounds = array<i64: 1, 1, 1>, scalar_prefetch = 0 : i64, scratch_operands = 1 : i64, tpu.core_type = #tpu.core_type<tc>, window_params = [{transform_indices = @transform_0, window_bounds = array<i64: 16, 32>}, {transform_indices = @transform_1, window_bounds = array<i64: 32, 192>}, {transform_indices = @transform_2, window_bounds = array<i64: 16, 192>}]} {
    %c0_i32 = arith.constant 0 : i32
    %0 = arith.cmpi eq, %arg2, %c0_i32 : i32
    %1 = arith.extui %0 : i1 to i32
    %c0_i32_0 = arith.constant 0 : i32
    %2 = arith.cmpi ne, %1, %c0_i32_0 : i32
    scf.if %2 {
      %cst_10 = arith.constant 0.000000e+00 : f32
      %12 = vector.broadcast %cst_10 : f32 to vector<16x192xf32>
      %c0_11 = arith.constant 0 : index
      %c0_12 = arith.constant 0 : index
      %13 = vector.load %arg6[%c0_11, %c0_12] : memref<16x192xf32, #tpu.memory_space<vmem>>, vector<16x192xf32>
      tpu.vector_store %arg6[%c0_11, %c0_12], %12 {strides = array<i32>} : memref<16x192xf32, #tpu.memory_space<vmem>>, vector<16x192xf32>,
    } else {
    }
    %c0 = arith.constant 0 : index
    %c0_1 = arith.constant 0 : index
    %3 = vector.load %arg6[%c0, %c0_1] : memref<16x192xf32, #tpu.memory_space<vmem>>, vector<16x192xf32>
    %c0_2 = arith.constant 0 : index
    %c0_3 = arith.constant 0 : index
    %4 = vector.load %arg3[%c0_2, %c0_3] : memref<16x32xf32, #tpu.memory_space<vmem>>, vector<16x32xf32>
    %c0_4 = arith.constant 0 : index
    %c0_5 = arith.constant 0 : index
    %5 = vector.load %arg4[%c0_4, %c0_5] : memref<32x192xf32, #tpu.memory_space<vmem>>, vector<32x192xf32>
    %cst = arith.constant dense<0.000000e+00> : vector<16x192xf32>
    %6 = tpu.matmul %4, %5, %cst {dimension_numbers = #tpu.dot_dimension_numbers<[1], [0], [0], [1], [0, 0, 1, 1], [], []>} : vector<16x32xf32>, vector<32x192xf32>, vector<16x192xf32> -> vector<16x192xf32>
    %7 = arith.addf %3, %6 : vector<16x192xf32>
    %c0_6 = arith.constant 0 : index
    %c0_7 = arith.constant 0 : index
    %8 = vector.load %arg6[%c0_6, %c0_7] : memref<16x192xf32, #tpu.memory_space<vmem>>, vector<16x192xf32>
    tpu.vector_store %arg6[%c0_6, %c0_7], %7 {strides = array<i32>} : memref<16x192xf32, #tpu.memory_space<vmem>>, vector<16x192xf32>,
    %c0_i32_8 = arith.constant 0 : i32
    %9 = arith.cmpi eq, %arg2, %c0_i32_8 : i32
    %10 = arith.extui %9 : i1 to i32
    %c0_i32_9 = arith.constant 0 : i32
    %11 = arith.cmpi ne, %10, %c0_i32_9 : i32
    scf.if %11 {
      %c0_10 = arith.constant 0 : index
      %c0_11 = arith.constant 0 : index
      %12 = vector.load %arg6[%c0_10, %c0_11] : memref<16x192xf32, #tpu.memory_space<vmem>>, vector<16x192xf32>
      %c0_12 = arith.constant 0 : index
      %c0_13 = arith.constant 0 : index
      %13 = vector.load %arg5[%c0_12, %c0_13] : memref<16x192xf32, #tpu.memory_space<vmem>>, vector<16x192xf32>
      tpu.vector_store %arg5[%c0_12, %c0_13], %12 {strides = array<i32>} : memref<16x192xf32, #tpu.memory_space<vmem>>, vector<16x192xf32>,
    } else {
    }
    return
  }
  func.func @transform_0(%arg0: i32, %arg1: i32, %arg2: i32) -> (i32, i32) {
    %c0_i32 = arith.constant 0 : i32
    return %arg0, %arg2 : i32, i32
  }
  func.func @transform_1(%arg0: i32, %arg1: i32, %arg2: i32) -> (i32, i32) {
    %c0_i32 = arith.constant 0 : i32
    return %arg2, %arg1 : i32, i32
  }
  func.func @transform_2(%arg0: i32, %arg1: i32, %arg2: i32) -> (i32, i32) {
    %c0_i32 = arith.constant 0 : i32
    return %arg0, %arg1 : i32, i32
  }
}

module attributes {stable_mosaic.version = 11 : i64} {
  func.func @_flash_attn_kernel(%arg0: i32, %arg1: i32, %arg2: i32, %arg3: memref<1x8x16xf32, #tpu.memory_space<vmem>>, %arg4: memref<1x8x16xf32, #tpu.memory_space<vmem>>, %arg5: memref<1x8x16xf32, #tpu.memory_space<vmem>>, %arg6: memref<1x8x16xf32, #tpu.memory_space<vmem>>, %arg7: memref<8x1xf32, #tpu.memory_space<vmem>>, %arg8: memref<8x1xf32, #tpu.memory_space<vmem>>, %arg9: memref<8x16xf32, #tpu.memory_space<vmem>>) attributes {dimension_semantics = [#tpu.dimension_semantics<parallel>, #tpu.dimension_semantics<parallel>, #tpu.dimension_semantics<arbitrary>], iteration_bounds = array<i64: 8, 1, 1>, scalar_prefetch = 0 : i64, scratch_operands = 3 : i64, tpu.core_type = #tpu.core_type<tc>, window_params = [{transform_indices = @transform_0, window_bounds = array<i64: 1, 8, 16>}, {transform_indices = @transform_1, window_bounds = array<i64: 1, 8, 16>}, {transform_indices = @transform_2, window_bounds = array<i64: 1, 8, 16>}, {transform_indices = @transform_3, window_bounds = array<i64: 1, 8, 16>}]} {
    %c0_i32 = arith.constant 0 : i32
    %0 = arith.cmpi eq, %arg2, %c0_i32 : i32
    %1 = arith.extui %0 : i1 to i32
    %c0_i32_0 = arith.constant 0 : i32
    %2 = arith.cmpi ne, %1, %c0_i32_0 : i32
    scf.if %2 {
      %cst = arith.constant 0xFF800000 : f32
      %12 = vector.broadcast %cst : f32 to vector<8x1xf32>
      %c0 = arith.constant 0 : index
      %c0_5 = arith.constant 0 : index
      %13 = vector.load %arg7[%c0, %c0_5] : memref<8x1xf32, #tpu.memory_space<vmem>>, vector<8x1xf32>
      tpu.vector_store %arg7[%c0, %c0_5], %12 {strides = array<i32>} : memref<8x1xf32, #tpu.memory_space<vmem>>, vector<8x1xf32>,
      %cst_6 = arith.constant 0.000000e+00 : f32
      %14 = vector.broadcast %cst_6 : f32 to vector<8x1xf32>
      %c0_7 = arith.constant 0 : index
      %c0_8 = arith.constant 0 : index
      %15 = vector.load %arg8[%c0_7, %c0_8] : memref<8x1xf32, #tpu.memory_space<vmem>>, vector<8x1xf32>
      tpu.vector_store %arg8[%c0_7, %c0_8], %14 {strides = array<i32>} : memref<8x1xf32, #tpu.memory_space<vmem>>, vector<8x1xf32>,
      %cst_9 = arith.constant 0.000000e+00 : f32
      %16 = vector.broadcast %cst_9 : f32 to vector<8x16xf32>
      %c0_10 = arith.constant 0 : index
      %c0_11 = arith.constant 0 : index
      %17 = vector.load %arg9[%c0_10, %c0_11] : memref<8x16xf32, #tpu.memory_space<vmem>>, vector<8x16xf32>
      tpu.vector_store %arg9[%c0_10, %c0_11], %16 {strides = array<i32>} : memref<8x16xf32, #tpu.memory_space<vmem>>, vector<8x16xf32>,
    } else {
    }
    %c8_i32 = arith.constant 8 : i32
    %3 = arith.muli %arg2, %c8_i32 : i32
    %c8_i32_1 = arith.constant 8 : i32
    %4 = arith.muli %arg1, %c8_i32_1 : i32
    %c7_i32 = arith.constant 7 : i32
    %5 = arith.addi %4, %c7_i32 : i32
    %6 = arith.cmpi sle, %3, %5 : i32
    %7 = arith.extui %6 : i1 to i32
    %c0_i32_2 = arith.constant 0 : i32
    %8 = arith.cmpi ne, %7, %c0_i32_2 : i32
    scf.if %8 {
      %c0 = arith.constant 0 : index
      %c0_5 = arith.constant 0 : index
      %c0_6 = arith.constant 0 : index
      %12 = vector.load %arg3[%c0, %c0_5, %c0_6] : memref<1x8x16xf32, #tpu.memory_space<vmem>>, vector<1x8x16xf32>
      %13 = vector.shape_cast %12 : vector<1x8x16xf32> to vector<8x16xf32>
      %cst = arith.constant 2.500000e-01 : f32
      %14 = vector.broadcast %cst : f32 to vector<8x16xf32>
      %15 = arith.mulf %13, %14 : vector<8x16xf32>
      %c0_7 = arith.constant 0 : index
      %c0_8 = arith.constant 0 : index
      %c0_9 = arith.constant 0 : index
      %16 = vector.load %arg4[%c0_7, %c0_8, %c0_9] : memref<1x8x16xf32, #tpu.memory_space<vmem>>, vector<1x8x16xf32>
      %17 = vector.shape_cast %16 : vector<1x8x16xf32> to vector<8x16xf32>
      %cst_10 = arith.constant dense<0.000000e+00> : vector<8x8xf32>
      %18 = tpu.matmul %15, %17, %cst_10 {dimension_numbers = #tpu.dot_dimension_numbers<[1], [1], [0], [0], [0, 0, 1, 0], [], []>} : vector<8x16xf32>, vector<8x16xf32>, vector<8x8xf32> -> vector<8x8xf32>
      %c8_i32_11 = arith.constant 8 : i32
      %19 = arith.muli %arg1, %c8_i32_11 : i32
      %20 = tpu.iota {dimensions = array<i32: 0>} : vector<8x8xi32>
      %21 = vector.broadcast %19 : i32 to vector<8x8xi32>
      %22 = arith.addi %21, %20 : vector<8x8xi32>
      %c8_i32_12 = arith.constant 8 : i32
      %23 = arith.muli %arg2, %c8_i32_12 : i32
      %24 = tpu.iota {dimensions = array<i32: 1>} : vector<8x8xi32>
      %25 = vector.broadcast %23 : i32 to vector<8x8xi32>
      %26 = arith.addi %25, %24 : vector<8x8xi32>
      %27 = arith.cmpi sgt, %26, %22 : vector<8x8xi32>
      %cst_13 = arith.constant -1.000000e+30 : f32
      %28 = vector.broadcast %cst_13 : f32 to vector<8x8xf32>
      %29 = arith.select %27, %28, %18 : vector<8x8xi1>, vector<8x8xf32>
      %c0_14 = arith.constant 0 : index
      %c0_15 = arith.constant 0 : index
      %30 = vector.load %arg7[%c0_14, %c0_15] : memref<8x1xf32, #tpu.memory_space<vmem>>, vector<8x1xf32>
      %cst_16 = arith.constant dense<0xFF800000> : vector<8xf32>
      %31 = vector.multi_reduction <maximumf>, %29, %cst_16 [1] : vector<8x8xf32> to vector<8xf32>
      %32 = vector.shape_cast %31 : vector<8xf32> to vector<8x1xf32>
      %33 = arith.maximumf %30, %32 : vector<8x1xf32>
      %34 = arith.subf %30, %33 : vector<8x1xf32>
      %35 = math.exp %34 : vector<8x1xf32>
      %36 = vector.broadcast %33 : vector<8x1xf32> to vector<8x8xf32>
      %37 = arith.subf %29, %36 : vector<8x8xf32>
      %38 = math.exp %37 : vector<8x8xf32>
      %c0_17 = arith.constant 0 : index
      %c0_18 = arith.constant 0 : index
      %39 = vector.load %arg8[%c0_17, %c0_18] : memref<8x1xf32, #tpu.memory_space<vmem>>, vector<8x1xf32>
      %40 = arith.mulf %35, %39 : vector<8x1xf32>
      %cst_19 = arith.constant dense<0.000000e+00> : vector<8xf32>
      %41 = vector.multi_reduction <add>, %38, %cst_19 [1] : vector<8x8xf32> to vector<8xf32>
      %42 = vector.shape_cast %41 : vector<8xf32> to vector<8x1xf32>
      %43 = arith.addf %40, %42 : vector<8x1xf32>
      %c0_20 = arith.constant 0 : index
      %c0_21 = arith.constant 0 : index
      %44 = vector.load %arg8[%c0_20, %c0_21] : memref<8x1xf32, #tpu.memory_space<vmem>>, vector<8x1xf32>
      tpu.vector_store %arg8[%c0_20, %c0_21], %43 {strides = array<i32>} : memref<8x1xf32, #tpu.memory_space<vmem>>, vector<8x1xf32>,
      %c0_22 = arith.constant 0 : index
      %c0_23 = arith.constant 0 : index
      %45 = vector.load %arg9[%c0_22, %c0_23] : memref<8x16xf32, #tpu.memory_space<vmem>>, vector<8x16xf32>
      %46 = vector.broadcast %35 : vector<8x1xf32> to vector<8x16xf32>
      %47 = arith.mulf %46, %45 : vector<8x16xf32>
      %c0_24 = arith.constant 0 : index
      %c0_25 = arith.constant 0 : index
      %c0_26 = arith.constant 0 : index
      %48 = vector.load %arg5[%c0_24, %c0_25, %c0_26] : memref<1x8x16xf32, #tpu.memory_space<vmem>>, vector<1x8x16xf32>
      %49 = vector.shape_cast %48 : vector<1x8x16xf32> to vector<8x16xf32>
      %cst_27 = arith.constant dense<0.000000e+00> : vector<8x16xf32>
      %50 = tpu.matmul %38, %49, %cst_27 {dimension_numbers = #tpu.dot_dimension_numbers<[1], [0], [0], [1], [0, 0, 1, 1], [], []>} : vector<8x8xf32>, vector<8x16xf32>, vector<8x16xf32> -> vector<8x16xf32>
      %51 = arith.addf %47, %50 : vector<8x16xf32>
      %c0_28 = arith.constant 0 : index
      %c0_29 = arith.constant 0 : index
      %52 = vector.load %arg9[%c0_28, %c0_29] : memref<8x16xf32, #tpu.memory_space<vmem>>, vector<8x16xf32>
      tpu.vector_store %arg9[%c0_28, %c0_29], %51 {strides = array<i32>} : memref<8x16xf32, #tpu.memory_space<vmem>>, vector<8x16xf32>,
      %c0_30 = arith.constant 0 : index
      %c0_31 = arith.constant 0 : index
      %53 = vector.load %arg7[%c0_30, %c0_31] : memref<8x1xf32, #tpu.memory_space<vmem>>, vector<8x1xf32>
      tpu.vector_store %arg7[%c0_30, %c0_31], %33 {strides = array<i32>} : memref<8x1xf32, #tpu.memory_space<vmem>>, vector<8x1xf32>,
    } else {
    }
    %c0_i32_3 = arith.constant 0 : i32
    %9 = arith.cmpi eq, %arg2, %c0_i32_3 : i32
    %10 = arith.extui %9 : i1 to i32
    %c0_i32_4 = arith.constant 0 : i32
    %11 = arith.cmpi ne, %10, %c0_i32_4 : i32
    scf.if %11 {
      %c0 = arith.constant 0 : index
      %c0_5 = arith.constant 0 : index
      %12 = vector.load %arg8[%c0, %c0_5] : memref<8x1xf32, #tpu.memory_space<vmem>>, vector<8x1xf32>
      %13 = tpu.reciprocal %12 {approx = true} : vector<8x1xf32> -> vector<8x1xf32>
      %c0_6 = arith.constant 0 : index
      %c0_7 = arith.constant 0 : index
      %14 = vector.load %arg9[%c0_6, %c0_7] : memref<8x16xf32, #tpu.memory_space<vmem>>, vector<8x16xf32>
      %15 = vector.broadcast %13 : vector<8x1xf32> to vector<8x16xf32>
      %16 = arith.mulf %14, %15 : vector<8x16xf32>
      %c0_8 = arith.constant 0 : index
      %c0_9 = arith.constant 0 : index
      %c0_10 = arith.constant 0 : index
      %17 = vector.load %arg6[%c0_8, %c0_9, %c0_10] : memref<1x8x16xf32, #tpu.memory_space<vmem>>, vector<1x8x16xf32>
      %18 = vector.shape_cast %17 : vector<1x8x16xf32> to vector<8x16xf32>
      %19 = vector.shape_cast %16 : vector<8x16xf32> to vector<1x8x16xf32>
      tpu.vector_store %arg6[%c0_8, %c0_9, %c0_10], %19 {strides = array<i32>} : memref<1x8x16xf32, #tpu.memory_space<vmem>>, vector<1x8x16xf32>,
    } else {
    }
    return
  }
  func.func @transform_0(%arg0: i32, %arg1: i32, %arg2: i32) -> (i32, i32, i32) {
    %c0_i32 = arith.constant 0 : i32
    %c0_i32_0 = arith.constant 0 : i32
    return %arg0, %arg1, %c0_i32 : i32, i32, i32
  }
  func.func @transform_1(%arg0: i32, %arg1: i32, %arg2: i32) -> (i32, i32, i32) {
    %c0_i32 = arith.constant 0 : i32
    %c0_i32_0 = arith.constant 0 : i32
    return %arg0, %arg2, %c0_i32 : i32, i32, i32
  }
  func.func @transform_2(%arg0: i32, %arg1: i32, %arg2: i32) -> (i32, i32, i32) {
    %c0_i32 = arith.constant 0 : i32
    %c0_i32_0 = arith.constant 0 : i32
    return %arg0, %arg2, %c0_i32 : i32, i32, i32
  }
  func.func @transform_3(%arg0: i32, %arg1: i32, %arg2: i32) -> (i32, i32, i32) {
    %c0_i32 = arith.constant 0 : i32
    %c0_i32_0 = arith.constant 0 : i32
    return %arg0, %arg1, %c0_i32 : i32, i32, i32
  }
}

module attributes {stable_mosaic.version = 11 : i64} {
  func.func @_linear_kernel(%arg0: i32, %arg1: i32, %arg2: i32, %arg3: memref<16x64xf32, #tpu.memory_space<vmem>>, %arg4: memref<64x32xf32, #tpu.memory_space<vmem>>, %arg5: memref<16x32xf32, #tpu.memory_space<vmem>>, %arg6: memref<16x32xf32, #tpu.memory_space<vmem>>, %arg7: memref<16x32xf32, #tpu.memory_space<vmem>>) attributes {dimension_semantics = [#tpu.dimension_semantics<parallel>, #tpu.dimension_semantics<parallel>, #tpu.dimension_semantics<arbitrary>], iteration_bounds = array<i64: 1, 1, 1>, scalar_prefetch = 0 : i64, scratch_operands = 1 : i64, tpu.core_type = #tpu.core_type<tc>, window_params = [{transform_indices = @transform_0, window_bounds = array<i64: 16, 64>}, {transform_indices = @transform_1, window_bounds = array<i64: 64, 32>}, {transform_indices = @transform_2, window_bounds = array<i64: 16, 32>}, {transform_indices = @transform_3, window_bounds = array<i64: 16, 32>}]} {
    %c0_i32 = arith.constant 0 : i32
    %0 = arith.cmpi eq, %arg2, %c0_i32 : i32
    %1 = arith.extui %0 : i1 to i32
    %c0_i32_0 = arith.constant 0 : i32
    %2 = arith.cmpi ne, %1, %c0_i32_0 : i32
    scf.if %2 {
      %cst_10 = arith.constant 0.000000e+00 : f32
      %12 = vector.broadcast %cst_10 : f32 to vector<16x32xf32>
      %c0_11 = arith.constant 0 : index
      %c0_12 = arith.constant 0 : index
      %13 = vector.load %arg7[%c0_11, %c0_12] : memref<16x32xf32, #tpu.memory_space<vmem>>, vector<16x32xf32>
      tpu.vector_store %arg7[%c0_11, %c0_12], %12 {strides = array<i32>} : memref<16x32xf32, #tpu.memory_space<vmem>>, vector<16x32xf32>,
    } else {
    }
    %c0 = arith.constant 0 : index
    %c0_1 = arith.constant 0 : index
    %3 = vector.load %arg7[%c0, %c0_1] : memref<16x32xf32, #tpu.memory_space<vmem>>, vector<16x32xf32>
    %c0_2 = arith.constant 0 : index
    %c0_3 = arith.constant 0 : index
    %4 = vector.load %arg3[%c0_2, %c0_3] : memref<16x64xf32, #tpu.memory_space<vmem>>, vector<16x64xf32>
    %c0_4 = arith.constant 0 : index
    %c0_5 = arith.constant 0 : index
    %5 = vector.load %arg4[%c0_4, %c0_5] : memref<64x32xf32, #tpu.memory_space<vmem>>, vector<64x32xf32>
    %cst = arith.constant dense<0.000000e+00> : vector<16x32xf32>
    %6 = tpu.matmul %4, %5, %cst {dimension_numbers = #tpu.dot_dimension_numbers<[1], [0], [0], [1], [0, 0, 1, 1], [], []>} : vector<16x64xf32>, vector<64x32xf32>, vector<16x32xf32> -> vector<16x32xf32>
    %7 = arith.addf %3, %6 : vector<16x32xf32>
    %c0_6 = arith.constant 0 : index
    %c0_7 = arith.constant 0 : index
    %8 = vector.load %arg7[%c0_6, %c0_7] : memref<16x32xf32, #tpu.memory_space<vmem>>, vector<16x32xf32>
    tpu.vector_store %arg7[%c0_6, %c0_7], %7 {strides = array<i32>} : memref<16x32xf32, #tpu.memory_space<vmem>>, vector<16x32xf32>,
    %c0_i32_8 = arith.constant 0 : i32
    %9 = arith.cmpi eq, %arg2, %c0_i32_8 : i32
    %10 = arith.extui %9 : i1 to i32
    %c0_i32_9 = arith.constant 0 : i32
    %11 = arith.cmpi ne, %10, %c0_i32_9 : i32
    scf.if %11 {
      %c0_10 = arith.constant 0 : index
      %c0_11 = arith.constant 0 : index
      %12 = vector.load %arg7[%c0_10, %c0_11] : memref<16x32xf32, #tpu.memory_space<vmem>>, vector<16x32xf32>
      %c0_12 = arith.constant 0 : index
      %c0_13 = arith.constant 0 : index
      %13 = vector.load %arg5[%c0_12, %c0_13] : memref<16x32xf32, #tpu.memory_space<vmem>>, vector<16x32xf32>
      %14 = arith.addf %12, %13 : vector<16x32xf32>
      %c0_14 = arith.constant 0 : index
      %c0_15 = arith.constant 0 : index
      %15 = vector.load %arg6[%c0_14, %c0_15] : memref<16x32xf32, #tpu.memory_space<vmem>>, vector<16x32xf32>
      tpu.vector_store %arg6[%c0_14, %c0_15], %14 {strides = array<i32>} : memref<16x32xf32, #tpu.memory_space<vmem>>, vector<16x32xf32>,
    } else {
    }
    return
  }
  func.func @transform_0(%arg0: i32, %arg1: i32, %arg2: i32) -> (i32, i32) {
    %c0_i32 = arith.constant 0 : i32
    return %arg0, %arg2 : i32, i32
  }
  func.func @transform_1(%arg0: i32, %arg1: i32, %arg2: i32) -> (i32, i32) {
    %c0_i32 = arith.constant 0 : i32
    return %arg2, %arg1 : i32, i32
  }
  func.func @transform_2(%arg0: i32, %arg1: i32, %arg2: i32) -> (i32, i32) {
    %c0_i32 = arith.constant 0 : i32
    return %arg0, %arg1 : i32, i32
  }
  func.func @transform_3(%arg0: i32, %arg1: i32, %arg2: i32) -> (i32, i32) {
    %c0_i32 = arith.constant 0 : i32
    return %arg0, %arg1 : i32, i32
  }
}

module attributes {stable_mosaic.version = 11 : i64} {
  func.func @_linear_kernel(%arg0: i32, %arg1: i32, %arg2: i32, %arg3: memref<16x32xf32, #tpu.memory_space<vmem>>, %arg4: memref<32x128xf32, #tpu.memory_space<vmem>>, %arg5: memref<1x128xf32, #tpu.memory_space<vmem>>, %arg6: memref<16x128xf32, #tpu.memory_space<vmem>>, %arg7: memref<16x128xf32, #tpu.memory_space<vmem>>) attributes {dimension_semantics = [#tpu.dimension_semantics<parallel>, #tpu.dimension_semantics<parallel>, #tpu.dimension_semantics<arbitrary>], iteration_bounds = array<i64: 1, 1, 1>, scalar_prefetch = 0 : i64, scratch_operands = 1 : i64, tpu.core_type = #tpu.core_type<tc>, window_params = [{transform_indices = @transform_0, window_bounds = array<i64: 16, 32>}, {transform_indices = @transform_1, window_bounds = array<i64: 32, 128>}, {transform_indices = @transform_2, window_bounds = array<i64: 1, 128>}, {transform_indices = @transform_3, window_bounds = array<i64: 16, 128>}]} {
    %c0_i32 = arith.constant 0 : i32
    %0 = arith.cmpi eq, %arg2, %c0_i32 : i32
    %1 = arith.extui %0 : i1 to i32
    %c0_i32_0 = arith.constant 0 : i32
    %2 = arith.cmpi ne, %1, %c0_i32_0 : i32
    scf.if %2 {
      %cst_10 = arith.constant 0.000000e+00 : f32
      %12 = vector.broadcast %cst_10 : f32 to vector<16x128xf32>
      %c0_11 = arith.constant 0 : index
      %c0_12 = arith.constant 0 : index
      %13 = vector.load %arg7[%c0_11, %c0_12] : memref<16x128xf32, #tpu.memory_space<vmem>>, vector<16x128xf32>
      tpu.vector_store %arg7[%c0_11, %c0_12], %12 {strides = array<i32>} : memref<16x128xf32, #tpu.memory_space<vmem>>, vector<16x128xf32>,
    } else {
    }
    %c0 = arith.constant 0 : index
    %c0_1 = arith.constant 0 : index
    %3 = vector.load %arg7[%c0, %c0_1] : memref<16x128xf32, #tpu.memory_space<vmem>>, vector<16x128xf32>
    %c0_2 = arith.constant 0 : index
    %c0_3 = arith.constant 0 : index
    %4 = vector.load %arg3[%c0_2, %c0_3] : memref<16x32xf32, #tpu.memory_space<vmem>>, vector<16x32xf32>
    %c0_4 = arith.constant 0 : index
    %c0_5 = arith.constant 0 : index
    %5 = vector.load %arg4[%c0_4, %c0_5] : memref<32x128xf32, #tpu.memory_space<vmem>>, vector<32x128xf32>
    %cst = arith.constant dense<0.000000e+00> : vector<16x128xf32>
    %6 = tpu.matmul %4, %5, %cst {dimension_numbers = #tpu.dot_dimension_numbers<[1], [0], [0], [1], [0, 0, 1, 1], [], []>} : vector<16x32xf32>, vector<32x128xf32>, vector<16x128xf32> -> vector<16x128xf32>
    %7 = arith.addf %3, %6 : vector<16x128xf32>
    %c0_6 = arith.constant 0 : index
    %c0_7 = arith.constant 0 : index
    %8 = vector.load %arg7[%c0_6, %c0_7] : memref<16x128xf32, #tpu.memory_space<vmem>>, vector<16x128xf32>
    tpu.vector_store %arg7[%c0_6, %c0_7], %7 {strides = array<i32>} : memref<16x128xf32, #tpu.memory_space<vmem>>, vector<16x128xf32>,
    %c0_i32_8 = arith.constant 0 : i32
    %9 = arith.cmpi eq, %arg2, %c0_i32_8 : i32
    %10 = arith.extui %9 : i1 to i32
    %c0_i32_9 = arith.constant 0 : i32
    %11 = arith.cmpi ne, %10, %c0_i32_9 : i32
    scf.if %11 {
      %c0_10 = arith.constant 0 : index
      %c0_11 = arith.constant 0 : index
      %12 = vector.load %arg7[%c0_10, %c0_11] : memref<16x128xf32, #tpu.memory_space<vmem>>, vector<16x128xf32>
      %c0_12 = arith.constant 0 : index
      %c0_13 = arith.constant 0 : index
      %13 = vector.load %arg5[%c0_12, %c0_13] : memref<1x128xf32, #tpu.memory_space<vmem>>, vector<1x128xf32>
      %14 = vector.broadcast %13 : vector<1x128xf32> to vector<16x128xf32>
      %15 = arith.addf %12, %14 : vector<16x128xf32>
      %16 = arith.mulf %15, %15 : vector<16x128xf32>
      %17 = arith.mulf %15, %16 : vector<16x128xf32>
      %cst_14 = arith.constant 4.471500e-02 : f32
      %18 = vector.broadcast %cst_14 : f32 to vector<16x128xf32>
      %19 = arith.mulf %18, %17 : vector<16x128xf32>
      %20 = arith.addf %15, %19 : vector<16x128xf32>
      %cst_15 = arith.constant 0.797884583 : f32
      %21 = vector.broadcast %cst_15 : f32 to vector<16x128xf32>
      %22 = arith.mulf %21, %20 : vector<16x128xf32>
      %23 = math.tanh %22 : vector<16x128xf32>
      %cst_16 = arith.constant 1.000000e+00 : f32
      %24 = vector.broadcast %cst_16 : f32 to vector<16x128xf32>
      %25 = arith.addf %24, %23 : vector<16x128xf32>
      %cst_17 = arith.constant 5.000000e-01 : f32
      %26 = vector.broadcast %cst_17 : f32 to vector<16x128xf32>
      %27 = arith.mulf %26, %25 : vector<16x128xf32>
      %28 = arith.mulf %15, %27 : vector<16x128xf32>
      %c0_18 = arith.constant 0 : index
      %c0_19 = arith.constant 0 : index
      %29 = vector.load %arg6[%c0_18, %c0_19] : memref<16x128xf32, #tpu.memory_space<vmem>>, vector<16x128xf32>
      tpu.vector_store %arg6[%c0_18, %c0_19], %28 {strides = array<i32>} : memref<16x128xf32, #tpu.memory_space<vmem>>, vector<16x128xf32>,
    } else {
    }
    return
  }
  func.func @transform_0(%arg0: i32, %arg1: i32, %arg2: i32) -> (i32, i32) {
    %c0_i32 = arith.constant 0 : i32
    return %arg0, %arg2 : i32, i32
  }
  func.func @transform_1(%arg0: i32, %arg1: i32, %arg2: i32) -> (i32, i32) {
    %c0_i32 = arith.constant 0 : i32
    return %arg2, %arg1 : i32, i32
  }
  func.func @transform_2(%arg0: i32, %arg1: i32, %arg2: i32) -> (i32, i32) {
    %c0_i32 = arith.constant 0 : i32
    %c0_i32_0 = arith.constant 0 : i32
    return %c0_i32, %arg1 : i32, i32
  }
  func.func @transform_3(%arg0: i32, %arg1: i32, %arg2: i32) -> (i32, i32) {
    %c0_i32 = arith.constant 0 : i32
    return %arg0, %arg1 : i32, i32
  }
}

module attributes {stable_mosaic.version = 11 : i64} {
  func.func @_linear_kernel(%arg0: i32, %arg1: i32, %arg2: i32, %arg3: memref<16x128xf32, #tpu.memory_space<vmem>>, %arg4: memref<128x32xf32, #tpu.memory_space<vmem>>, %arg5: memref<1x32xf32, #tpu.memory_space<vmem>>, %arg6: memref<16x32xf32, #tpu.memory_space<vmem>>, %arg7: memref<16x32xf32, #tpu.memory_space<vmem>>, %arg8: memref<16x32xf32, #tpu.memory_space<vmem>>) attributes {dimension_semantics = [#tpu.dimension_semantics<parallel>, #tpu.dimension_semantics<parallel>, #tpu.dimension_semantics<arbitrary>], iteration_bounds = array<i64: 1, 1, 1>, scalar_prefetch = 0 : i64, scratch_operands = 1 : i64, tpu.core_type = #tpu.core_type<tc>, window_params = [{transform_indices = @transform_0, window_bounds = array<i64: 16, 128>}, {transform_indices = @transform_1, window_bounds = array<i64: 128, 32>}, {transform_indices = @transform_2, window_bounds = array<i64: 1, 32>}, {transform_indices = @transform_3, window_bounds = array<i64: 16, 32>}, {transform_indices = @transform_4, window_bounds = array<i64: 16, 32>}]} {
    %c0_i32 = arith.constant 0 : i32
    %0 = arith.cmpi eq, %arg2, %c0_i32 : i32
    %1 = arith.extui %0 : i1 to i32
    %c0_i32_0 = arith.constant 0 : i32
    %2 = arith.cmpi ne, %1, %c0_i32_0 : i32
    scf.if %2 {
      %cst_10 = arith.constant 0.000000e+00 : f32
      %12 = vector.broadcast %cst_10 : f32 to vector<16x32xf32>
      %c0_11 = arith.constant 0 : index
      %c0_12 = arith.constant 0 : index
      %13 = vector.load %arg8[%c0_11, %c0_12] : memref<16x32xf32, #tpu.memory_space<vmem>>, vector<16x32xf32>
      tpu.vector_store %arg8[%c0_11, %c0_12], %12 {strides = array<i32>} : memref<16x32xf32, #tpu.memory_space<vmem>>, vector<16x32xf32>,
    } else {
    }
    %c0 = arith.constant 0 : index
    %c0_1 = arith.constant 0 : index
    %3 = vector.load %arg8[%c0, %c0_1] : memref<16x32xf32, #tpu.memory_space<vmem>>, vector<16x32xf32>
    %c0_2 = arith.constant 0 : index
    %c0_3 = arith.constant 0 : index
    %4 = vector.load %arg3[%c0_2, %c0_3] : memref<16x128xf32, #tpu.memory_space<vmem>>, vector<16x128xf32>
    %c0_4 = arith.constant 0 : index
    %c0_5 = arith.constant 0 : index
    %5 = vector.load %arg4[%c0_4, %c0_5] : memref<128x32xf32, #tpu.memory_space<vmem>>, vector<128x32xf32>
    %cst = arith.constant dense<0.000000e+00> : vector<16x32xf32>
    %6 = tpu.matmul %4, %5, %cst {dimension_numbers = #tpu.dot_dimension_numbers<[1], [0], [0], [1], [0, 0, 1, 1], [], []>} : vector<16x128xf32>, vector<128x32xf32>, vector<16x32xf32> -> vector<16x32xf32>
    %7 = arith.addf %3, %6 : vector<16x32xf32>
    %c0_6 = arith.constant 0 : index
    %c0_7 = arith.constant 0 : index
    %8 = vector.load %arg8[%c0_6, %c0_7] : memref<16x32xf32, #tpu.memory_space<vmem>>, vector<16x32xf32>
    tpu.vector_store %arg8[%c0_6, %c0_7], %7 {strides = array<i32>} : memref<16x32xf32, #tpu.memory_space<vmem>>, vector<16x32xf32>,
    %c0_i32_8 = arith.constant 0 : i32
    %9 = arith.cmpi eq, %arg2, %c0_i32_8 : i32
    %10 = arith.extui %9 : i1 to i32
    %c0_i32_9 = arith.constant 0 : i32
    %11 = arith.cmpi ne, %10, %c0_i32_9 : i32
    scf.if %11 {
      %c0_10 = arith.constant 0 : index
      %c0_11 = arith.constant 0 : index
      %12 = vector.load %arg8[%c0_10, %c0_11] : memref<16x32xf32, #tpu.memory_space<vmem>>, vector<16x32xf32>
      %c0_12 = arith.constant 0 : index
      %c0_13 = arith.constant 0 : index
      %13 = vector.load %arg5[%c0_12, %c0_13] : memref<1x32xf32, #tpu.memory_space<vmem>>, vector<1x32xf32>
      %14 = vector.broadcast %13 : vector<1x32xf32> to vector<16x32xf32>
      %15 = arith.addf %12, %14 : vector<16x32xf32>
      %c0_14 = arith.constant 0 : index
      %c0_15 = arith.constant 0 : index
      %16 = vector.load %arg6[%c0_14, %c0_15] : memref<16x32xf32, #tpu.memory_space<vmem>>, vector<16x32xf32>
      %17 = arith.addf %15, %16 : vector<16x32xf32>
      %c0_16 = arith.constant 0 : index
      %c0_17 = arith.constant 0 : index
      %18 = vector.load %arg7[%c0_16, %c0_17] : memref<16x32xf32, #tpu.memory_space<vmem>>, vector<16x32xf32>
      tpu.vector_store %arg7[%c0_16, %c0_17], %17 {strides = array<i32>} : memref<16x32xf32, #tpu.memory_space<vmem>>, vector<16x32xf32>,
    } else {
    }
    return
  }
  func.func @transform_0(%arg0: i32, %arg1: i32, %arg2: i32) -> (i32, i32) {
    %c0_i32 = arith.constant 0 : i32
    return %arg0, %arg2 : i32, i32
  }
  func.func @transform_1(%arg0: i32, %arg1: i32, %arg2: i32) -> (i32, i32) {
    %c0_i32 = arith.constant 0 : i32
    return %arg2, %arg1 : i32, i32
  }
  func.func @transform_2(%arg0: i32, %arg1: i32, %arg2: i32) -> (i32, i32) {
    %c0_i32 = arith.constant 0 : i32
    %c0_i32_0 = arith.constant 0 : i32
    return %c0_i32, %arg1 : i32, i32
  }
  func.func @transform_3(%arg0: i32, %arg1: i32, %arg2: i32) -> (i32, i32) {
    %c0_i32 = arith.constant 0 : i32
    return %arg0, %arg1 : i32, i32
  }
  func.func @transform_4(%arg0: i32, %arg1: i32, %arg2: i32) -> (i32, i32) {
    %c0_i32 = arith.constant 0 : i32
    return %arg0, %arg1 : i32, i32
  }
}

module attributes {stable_mosaic.version = 11 : i64} {
  func.func @_linear_kernel(%arg0: i32, %arg1: i32, %arg2: i32, %arg3: memref<16x32xf32, #tpu.memory_space<vmem>>, %arg4: memref<32x256xf32, #tpu.memory_space<vmem>>, %arg5: memref<16x256xf32, #tpu.memory_space<vmem>>, %arg6: memref<16x256xf32, #tpu.memory_space<vmem>>) attributes {dimension_semantics = [#tpu.dimension_semantics<parallel>, #tpu.dimension_semantics<parallel>, #tpu.dimension_semantics<arbitrary>], iteration_bounds = array<i64: 1, 1, 1>, scalar_prefetch = 0 : i64, scratch_operands = 1 : i64, tpu.core_type = #tpu.core_type<tc>, window_params = [{transform_indices = @transform_0, window_bounds = array<i64: 16, 32>}, {transform_indices = @transform_1, window_bounds = array<i64: 32, 256>}, {transform_indices = @transform_2, window_bounds = array<i64: 16, 256>}]} {
    %c0_i32 = arith.constant 0 : i32
    %0 = arith.cmpi eq, %arg2, %c0_i32 : i32
    %1 = arith.extui %0 : i1 to i32
    %c0_i32_0 = arith.constant 0 : i32
    %2 = arith.cmpi ne, %1, %c0_i32_0 : i32
    scf.if %2 {
      %cst_10 = arith.constant 0.000000e+00 : f32
      %12 = vector.broadcast %cst_10 : f32 to vector<16x256xf32>
      %c0_11 = arith.constant 0 : index
      %c0_12 = arith.constant 0 : index
      %13 = vector.load %arg6[%c0_11, %c0_12] : memref<16x256xf32, #tpu.memory_space<vmem>>, vector<16x256xf32>
      tpu.vector_store %arg6[%c0_11, %c0_12], %12 {strides = array<i32>} : memref<16x256xf32, #tpu.memory_space<vmem>>, vector<16x256xf32>,
    } else {
    }
    %c0 = arith.constant 0 : index
    %c0_1 = arith.constant 0 : index
    %3 = vector.load %arg6[%c0, %c0_1] : memref<16x256xf32, #tpu.memory_space<vmem>>, vector<16x256xf32>
    %c0_2 = arith.constant 0 : index
    %c0_3 = arith.constant 0 : index
    %4 = vector.load %arg3[%c0_2, %c0_3] : memref<16x32xf32, #tpu.memory_space<vmem>>, vector<16x32xf32>
    %c0_4 = arith.constant 0 : index
    %c0_5 = arith.constant 0 : index
    %5 = vector.load %arg4[%c0_4, %c0_5] : memref<32x256xf32, #tpu.memory_space<vmem>>, vector<32x256xf32>
    %cst = arith.constant dense<0.000000e+00> : vector<16x256xf32>
    %6 = tpu.matmul %4, %5, %cst {dimension_numbers = #tpu.dot_dimension_numbers<[1], [0], [0], [1], [0, 0, 1, 1], [], []>} : vector<16x32xf32>, vector<32x256xf32>, vector<16x256xf32> -> vector<16x256xf32>
    %7 = arith.addf %3, %6 : vector<16x256xf32>
    %c0_6 = arith.constant 0 : index
    %c0_7 = arith.constant 0 : index
    %8 = vector.load %arg6[%c0_6, %c0_7] : memref<16x256xf32, #tpu.memory_space<vmem>>, vector<16x256xf32>
    tpu.vector_store %arg6[%c0_6, %c0_7], %7 {strides = array<i32>} : memref<16x256xf32, #tpu.memory_space<vmem>>, vector<16x256xf32>,
    %c0_i32_8 = arith.constant 0 : i32
    %9 = arith.cmpi eq, %arg2, %c0_i32_8 : i32
    %10 = arith.extui %9 : i1 to i32
    %c0_i32_9 = arith.constant 0 : i32
    %11 = arith.cmpi ne, %10, %c0_i32_9 : i32
    scf.if %11 {
      %c0_10 = arith.constant 0 : index
      %c0_11 = arith.constant 0 : index
      %12 = vector.load %arg6[%c0_10, %c0_11] : memref<16x256xf32, #tpu.memory_space<vmem>>, vector<16x256xf32>
      %c0_12 = arith.constant 0 : index
      %c0_13 = arith.constant 0 : index
      %13 = vector.load %arg5[%c0_12, %c0_13] : memref<16x256xf32, #tpu.memory_space<vmem>>, vector<16x256xf32>
      tpu.vector_store %arg5[%c0_12, %c0_13], %12 {strides = array<i32>} : memref<16x256xf32, #tpu.memory_space<vmem>>, vector<16x256xf32>,
    } else {
    }
    return
  }
  func.func @transform_0(%arg0: i32, %arg1: i32, %arg2: i32) -> (i32, i32) {
    %c0_i32 = arith.constant 0 : i32
    return %arg0, %arg2 : i32, i32
  }
  func.func @transform_1(%arg0: i32, %arg1: i32, %arg2: i32) -> (i32, i32) {
    %c0_i32 = arith.constant 0 : i32
    return %arg2, %arg1 : i32, i32
  }
  func.func @transform_2(%arg0: i32, %arg1: i32, %arg2: i32) -> (i32, i32) {
    %c0_i32 = arith.constant 0 : i32
    return %arg0, %arg1 : i32, i32
  }
}

</mosaic_0001>

<bundles_post_ra>
// kernel: transformer_forward_pallas.16
= control target key start
LH: loop header
LB: loop body
LE: loop exit
PB: predicated region body
PF: predicated region fallthrough
CT: control target
= control target key end

     0   :  { %vm16_vm0 = vcmask 261120   ;;  %s118_s0 = inlined_call_operand.vmem [shape: f32[16,32], index: 0, kind: input, shape index: {}]   ;;  %s119_s1 = inlined_call_operand.vmem [shape: f32[1,32], index: 1, kind: input, shape index: {}]   ;;  %s120_s2 = inlined_call_operand.vmem [shape: f32[1,32], index: 2, kind: input, shape index: {}]   ;;  %s121_s3 = inlined_call_operand.vmem [shape: f32[16,32], index: 3, kind: output, shape index: {}]  }
   0x1   :  { %v14_v0 = vld [vmem:[%s118_s0] sm:$0xff]  ;;  %v15_v1 = vld [vmem:[%s118_s0 + $0x8] sm:$0xff] }
   0x2   :  { %v17_v2 = vsel %vm16_vm0, %v14_v0, 0.0  ;;  %v20_v3 = vsel %vm16_vm0, %v15_v1, 0.0  ;;  %v68_v21 = vld [vmem:[%s119_s1] ss:$0 sm:$0xff] }
   0x3   :  { %18 = vadd.xlane.f32.xlu0 %v17_v2  ;;  %v69_v23 = vld [vmem:[%s120_s2] ss:$0 sm:$0xff] }
   0x7   :  { %21 = vadd.xlane.f32.xlu0 %v20_v3 }
  0x8c   :  { %v19_v4 = vpop.xlane.xlu0 %18 }
  0x8d   :  { %v24_v5 = vmul.f32 0.03125, %v19_v4 }
  0x8f   :  { %v26_v6 = vsub.f32 %v14_v0, %v24_v5 }
  0x90   :  { %v22_v7 = vpop.xlane.xlu0 %21 }
  0x91   :  { %v25_v8 = vmul.f32 0.03125, %v22_v7  ;;  %v28_v9 = vmul.f32 %v26_v6, %v26_v6 }
  0x93   :  { %v27_v10 = vsub.f32 %v15_v1, %v25_v8  ;;  %v30_v11 = vsel %vm16_vm0, %v28_v9, 0.0 }
  0x94   :  { %31 = vadd.xlane.f32.xlu1 %v30_v11 }
  0x95   :  { %v29_v12 = vmul.f32 %v27_v10, %v27_v10 }
  0x97   :  { %v33_v13 = vsel %vm16_vm0, %v29_v12, 0.0 }
  0x98   :  { %34 = vadd.xlane.f32.xlu1 %v33_v13 }
 0x11d   :  { %v32_v14 = vpop.xlane.xlu1 %31 }
 0x11e   :  { %v36_v15 = vmul.f32 0.03125, %v32_v14 }
 0x120   :  { %v38_v16 = vadd.f32 1e-05, %v36_v15 }
 0x121   :  { %v35_v17 = vpop.xlane.xlu1 %34 }
 0x122   :  { %70 = vrsqrt.f32 %v38_v16  ;;  %v37_v18 = vmul.f32 0.03125, %v35_v17 }
 0x124   :  { %v39_v19 = vadd.f32 1e-05, %v37_v18 }
 0x126   :  { %72 = vrsqrt.f32 %v39_v19 }
 0x12f   :  { %v71_v20 = vpop.eup %70 }
 0x130   :  { %v42_v22 = vmul.f32 %v71_v20, %v26_v6 }
 0x132   :  { %v51_v24 = vmul.f32 %v68_v21, %v42_v22 }
 0x133   :  { %v73_v25 = vpop.eup %72 }
 0x134   :  { %v60_v26 = vadd.f32 %v69_v23, %v51_v24  ;;  %v43_v27 = vmul.f32 %v73_v25, %v27_v10 }
 0x136   :  { %62 = vst.msk [vmem:[%s121_s3] sm:$0xff] %vm16_vm0, %v60_v26  ;;  %v52_v28 = vmul.f32 %v68_v21, %v43_v27 }
 0x138   :  { %v61_v29 = vadd.f32 %v69_v23, %v52_v28 }
 0x13a   :  { %63 = vst.msk [vmem:[%s121_s3 + $0x8] sm:$0xff] %vm16_vm0, %v61_v29 }

// kernel: transformer_forward_pallas.17
= control target key start
LH: loop header
LB: loop body
LE: loop exit
PB: predicated region body
PF: predicated region fallthrough
CT: control target
= control target key end

     0   :  { %v153_v3 = vmov 0.0   ;;  %vm34_vm0 = vcmask 261120   ;;  %vm16_vm1 = vcmask 523264   ;;  %s217_s1 = inlined_call_operand.vmem [shape: f32[32,192], index: 1, kind: input, shape index: {}]   ;;  %s218_s0 = inlined_call_operand.vmem [shape: f32[16,32], index: 0, kind: input, shape index: {}]   ;;  %s219_s2 = inlined_call_operand.vmem [shape: f32[16,192], index: 2, kind: output, shape index: {}]  }
   0x1   :  { %v33_v0 = vld [vmem:[%s217_s1 + $0x38] sm:$0xff]  ;;  %v32_v1 = vld [vmem:[%s217_s1 + $0x30] sm:$0xff]  ;;  %v31_v2 = vld [vmem:[%s217_s1 + $0x28] sm:$0xff]  ;;  %105 = vmatprep.mubr.f32.mxu0 %v153_v3  ;;  %111 = vmatprep.mubr.f32.mxu1 %v153_v3  ;;  %17 = vst.msk [vmem:[#allocation2 + $0x8] sm:$0xff] %vm16_vm1, %v153_v3 }
   0x2   :  { %65 = vmatprep.subr.mxu0 %v33_v0  ;;  %144 = vmatprep.subr.mxu1 %v33_v0  ;;  %v30_v4 = vld [vmem:[%s217_s1 + $0x20] sm:$0xff]  ;;  %v29_v5 = vld [vmem:[%s217_s1 + $0x18] sm:$0xff]  ;;  %v28_v6 = vld [vmem:[%s217_s1 + $0x10] sm:$0xff]  ;;  %19 = vst.msk [vmem:[#allocation2 + $0x18] sm:$0xff] %vm16_vm1, %v153_v3 }
   0x3   :  { %66 = vmatpush1.msra.mxu0 %v32_v1  ;;  %148 = vmatpush1.msra.mxu1 %v32_v1  ;;  %v27_v7 = vld [vmem:[%s217_s1 + $0x8] sm:$0xff]  ;;  %v26_v8 = vld [vmem:[%s217_s1] sm:$0xff] }
   0x4   :  { %67 = vmatprep.subr.mxu0 %v31_v2  ;;  %145 = vmatprep.subr.mxu1 %v31_v2  ;;  %v24_v9 = vld [vmem:[%s218_s0] sm:$0xff]  ;;  %v25_v10 = vld [vmem:[%s218_s0 + $0x8] sm:$0xff] }
   0x5   :  { %68 = vmatpush1.msra.mxu0 %v30_v4  ;;  %149 = vmatpush1.msra.mxu1 %v30_v4 }
   0x6   :  { %69 = vmatprep.subr.mxu0 %v29_v5  ;;  %146 = vmatprep.subr.mxu1 %v29_v5 }
   0x7   :  { %70 = vmatpush1.msra.mxu0 %v28_v6  ;;  %150 = vmatpush1.msra.mxu1 %v28_v6 }
   0x8   :  { %71 = vmatprep.subr.mxu0 %v27_v7  ;;  %147 = vmatprep.subr.mxu1 %v27_v7  ;;  %v21_v13 = vld [vmem:[#allocation2 + $0x8] sm:$0xff] }
   0x9   :  { %72 = vmatpush1.msra.mxu0 %v26_v8  ;;  %151 = vmatpush1.msra.mxu1 %v26_v8  ;;  %v23_v14 = vld [vmem:[#allocation2 + $0x18] sm:$0xff] }
   0xa   :  { %142 = vmatmul.mubr.msk.f32.vlgmr.msra.gmra.mxu0 %vm34_vm0, %v24_v9  ;;  %143 = vmatmul.mubr.msk.f32.vlgmr.msra.gmra.mxu1 %vm34_vm0, %v25_v10 }
  0xca   :  { %v107_v11 = vpop.f32.mrf.mxu0  ;;  %v113_v12 = vpop.f32.mrf.mxu1 }
  0xcb   :  { %134 = vst [vmem:[%s219_s2] sm:$0xff] %v107_v11  ;;  %136 = vst [vmem:[%s219_s2 + $0x10] sm:$0xff] %v113_v12 }
  0xcc   :  { %v109_v15 = vpop.f32.mrf.mxu0  ;;  %v115_v16 = vpop.f32.mrf.mxu1 }
  0xcd   :  { %v119_v17 = vadd.f32 %v109_v15, %v21_v13  ;;  %v121_v18 = vadd.f32 %v115_v16, %v23_v14 }
  0xcf   :  { %124 = vst.msk [vmem:[#allocation2 + $0x8] sm:$0xff] %vm16_vm1, %v119_v17  ;;  %126 = vst.msk [vmem:[#allocation2 + $0x18] sm:$0xff] %vm16_vm1, %v121_v18 }
  0xd6   :  { %v131_v19 = vld [vmem:[#allocation2 + $0x8] sm:$0xff]  ;;  %v133_v20 = vld [vmem:[#allocation2 + $0x18] sm:$0xff] }
  0xd7   :  { %135 = vst.msk [vmem:[%s219_s2 + $0x8] sm:$0xff] %vm16_vm1, %v131_v19  ;;  %137 = vst.msk [vmem:[%s219_s2 + $0x18] sm:$0xff] %vm16_vm1, %v133_v20 }

// kernel: transformer_forward_pallas.18
= control target key start
LH: loop header
LB: loop body
LE: loop exit
PB: predicated region body
PF: predicated region fallthrough
CT: control target
= control target key end

     0   :  { %s708_s12 = smov 0   ;;  %s710_s13 = smov 0   ;;  %s765_s0 = inlined_call_operand.vmem [shape: f32[8,8,16], index: 0, kind: input, shape index: {}]   ;;  %s766_s1 = inlined_call_operand.vmem [shape: f32[8,8,16], index: 1, kind: input, shape index: {}]   ;;  %s767_s2 = inlined_call_operand.vmem [shape: f32[8,8,16], index: 2, kind: input, shape index: {}]   ;;  %s768_s3 = inlined_call_operand.vmem [shape: f32[8,8,16], index: 3, kind: output, shape index: {}]  }
   0x1   :  { %s712_s14 = smov 0  }
   0x2 LB: > { %s32_s15 = sadd.s32 1, %s678_s13  ;;  %p600_p0 = scmp.ge.s32.totalorder %s682_s14, 1  ;;  %s682_s14 = sphi %s712_s14, %s13_s14   ;;  %s678_s13 = sphi %s710_s13, %s770_s13   ;;  %s674_s12 = sphi %s708_s12, %s769_s12  }
   0x3   : > { %p34_p1 = scmp.ge.s32.totalorder %s32_s15, 8  ;;  %p190_p2 = scmp.lt.s32.totalorder %s682_s14, 9 }
   0x5   : > { %s772_s15 = smov (%p34_p1, %s32_s15), 0  ;;  %p191_p3 = pnand %p600_p0, %p190_p2 }
   0x6   : > { %p232_p4 = scmp.lt.s32.totalorder (!%p191_p3), %s674_s12, 7 }
   0x7   : > { %194 = sbr.rel (%p191_p3) target bundleno = 786 (0x312), region = 32 }
   0xc   : > { %vm267_vm0 = vcmask 130048   ;;  %v684_v0 = vmov 0.0   ;;  %vm685_vm1 = vmmov 0   ;;  %s774_s12 = smov (!%p232_p4, %s674_s12), 7  ;;  %vm264_vm2 = vcmask 7168  }
   0xd   : > { %614 = vmatprep.subr.mxu0 %v684_v0  ;;  %268 = vst.msk [vmem:[#allocation4] sm:$0xff] %vm267_vm0, %v684_v0  ;;  %616 = vmatprep.mubr.msk.f32.mxu0 %vm685_vm1, %v684_v0  ;;  %s727_s16 = sshll.u32 %s774_s12, 3  ;;  %v686_v4 = vmov -inf   ;;  %v356_v5 = vlaneseq  ;;  %vm367_vm4 = vcmask 64512   ;;  %v687_v12 = vmov 0  }
   0xe   : > { %619 = vmatprep.subr.mxu1 %v684_v0  ;;  %621 = vmatprep.mubr.msk.f32.mxu1 %vm685_vm1, %v684_v0  ;;  %s245_s19 = scalar_lea.vmem %s766_s1, %s727_s16  ;;  %s238_s22 = scalar_lea.vmem %s765_s0, %s727_s16  ;;  %265 = vst.msk [vmem:[#allocation2] sm:$0xff] %vm264_vm2, %v686_v4  ;;  %266 = vst.msk [vmem:[#allocation3] sm:$0xff] %vm264_vm2, %v684_v0 }
   0xf   : > { %v278_v1 = vld [vmem:[%s245_s19] sm:$0xff]  ;;  %v357_v6 = vshrl.u32 %v356_v5, 7  ;;  %v361_v7 = vand.u32 127, %v356_v5  ;;  %652 = vset.pattern.permute.xlu0 %v687_v12  ;;  %653 = vset.pattern.permute.xlu1 %v687_v12  ;;  %s252_s25 = scalar_lea.vmem %s767_s2, %s727_s16  ;;  %s259_s28 = scalar_lea.vmem %s768_s3, %s727_s16 }
  0x10   : > { %v276_v2 = vld [vmem:[%s238_s22] sm:$0xff]  ;;  %615 = vmatpush3.xpose.msk.msra.mxu0 %vm267_vm0, %v278_v1 }
  0x11   : > { %v277_v3 = vmul.f32 0.25, %v276_v2  ;;  %vm364_vm3 = vcmp.gt.s32.totalorder %v361_v7, %v357_v6  ;;  %v398_v17 = vld [vmem:[%s252_s25] sm:$0xff] }
  0x12   : > { %620 = vmatpush3.msra.mxu1 %v398_v17 }
  0x13   : > { %617 = vmatmul.mubr.msk.f32.vlgmr.msra.gmra.mxu0 %vm267_vm0, %v277_v3 }
  0x14   : > { %v391_v31 = vld [vmem:[#allocation4] sm:$0xff] }
  0x15   : > { %v366_v13 = vld [vmem:[#allocation2] sm:$0xff]  ;;  %v383_v25 = vld [vmem:[#allocation3] sm:$0xff] }
  0xd3   : > { %v352_v8 = vpop.f32.mrf.mxu0 }
  0xd4   : > { %v365_v9 = vsel %vm364_vm3, -1e+30, %v352_v8 }
  0xd5   : > { %v618_v10 = vpop.f32.mrf.mxu0  ;;  %v368_v11 = vsel %vm367_vm4, %v365_v9, -inf }
  0xd6   : > { %369 = vmax.xlane.f32.xlu0 %v368_v11 }
 0x15f   : > { %v370_v14 = vpop.xlane.xlu0 %369 }
 0x160   : > { %v371_v15 = vmax.f32 %v366_v13, %v370_v14 }
 0x162   : > { %v372_v16 = vsub.f32 %v366_v13, %v371_v15  ;;  %474 = vst.msk [vmem:[#allocation2] sm:$0xff] %vm264_vm2, %v371_v15  ;;  %377 = vperm.xlu0 %652, %v371_v15  }
 0x164   : > { %v373_v22 = vmul.f32 1.442695, %v372_v16 }
 0x1dd   : > { %v378_v18 = vpop.permute.xlu0 %377 }
 0x1de   : > { %v380_v19 = vsub.f32 %v365_v9, %v378_v18 }
 0x1e0   : > { %v381_v20 = vmul.f32 1.442695, %v380_v19 }
 0x1e2   : > { %654 = vpow2.f32 %v381_v20 }
 0x1e3   : > { %656 = vpow2.f32 %v373_v22 }
 0x1ef   : > { %v655_v21 = vpop.eup %654 }
 0x1f0   : > { %622 = vmatmul.mubr.msk.f32.vlgmr.msra.gmra.mxu1 %vm367_vm4, %v655_v21  ;;  %v385_v23 = vsel %vm367_vm4, %v655_v21, 0.0  ;;  %v657_v24 = vpop.eup %656 }
 0x1f1   : > { %386 = vadd.xlane.f32.xlu1 %v385_v23  ;;  %v384_v26 = vmul.f32 %v657_v24, %v383_v25 }
 0x202   : > { %394 = vperm.xlu1 %653, %v657_v24  }
 0x27a   : > { %v387_v27 = vpop.xlane.xlu1 %386 }
 0x27b   : > { %v388_v28 = vadd.f32 %v387_v27, %v384_v26 }
 0x27d   : > { %390 = vst.msk [vmem:[#allocation3] sm:$0xff] %vm264_vm2, %v388_v28 }
 0x27e   : > { %v395_v32 = vpop.permute.xlu1 %394 }
 0x27f   : > { %v397_v33 = vmul.f32 %v395_v32, %v391_v31 }
 0x284   : > { %v478_v29 = vld [vmem:[#allocation3] sm:$0xff] }
 0x285   : > { %658 = vrcp.f32 %v478_v29 }
 0x292   : > { %v659_v30 = vpop.eup %658 }
 0x293   : > { %483 = vperm.xlu1 %653, %v659_v30  }
 0x2b0   : > { %v468_v34 = vpop.f32.mrf.mxu1 }
 0x2b1   : > { %v472_v35 = vadd.f32 %v468_v34, %v397_v33 }
 0x2b2   : > { %v623_v36 = vpop.f32.mrf.mxu1 }
 0x2b3   : > { %473 = vst.msk [vmem:[#allocation4] sm:$0xff] %vm267_vm0, %v472_v35 }
 0x2ba   : > { %v480_v37 = vld [vmem:[#allocation4] sm:$0xff] }
 0x30e   : > { %v484_v38 = vpop.permute.xlu1 %483 }
 0x30f   : > { %v486_v39 = vmul.f32 %v484_v38, %v480_v37 }
 0x311   : > { %488 = vst.msk [vmem:[%s259_s28] sm:$0xff] %vm267_vm0, %v486_v39 }
 0x312 PF: > { %s13_s14 = sadd.s32 1, %s682_s14   ;;  %s769_s12 = smov %s678_s13 }
 0x313   : > { %p10_p5 = scmp.ge.s32.totalorder %s13_s14, 10   ;;  %s770_s13 = smov %s772_s15 }
 0x315   :  { %12 = sbr.rel (!%p10_p5) target bundleno = 2 (0x2), region = 80 }

// kernel: transformer_forward_pallas.19
= control target key start
LH: loop header
LB: loop body
LE: loop exit
PB: predicated region body
PF: predicated region fallthrough
CT: control target
= control target key end

     0   :  { %vm18_vm0 = vcmask 261120   ;;  %vm33_vm1 = vcmask 523264   ;;  %v167_v2 = vmov 0.0   ;;  %s238_s1 = inlined_call_operand.vmem [shape: f32[64,32], index: 1, kind: input, shape index: {}]   ;;  %s239_s0 = inlined_call_operand.vmem [shape: f32[16,64], index: 0, kind: input, shape index: {}]   ;;  %s240_s2 = inlined_call_operand.vmem [shape: f32[16,32], index: 2, kind: input, shape index: {}]   ;;  %s241_s3 = inlined_call_operand.vmem [shape: f32[16,32], index: 3, kind: output, shape index: {}]  }
   0x1   :  { %v32_v0 = vld [vmem:[%s238_s1 + $0x38] sm:$0xff]  ;;  %v31_v1 = vld [vmem:[%s238_s1 + $0x30] sm:$0xff]  ;;  %20 = vst.msk [vmem:[#allocation2 + $0x8] sm:$0xff] %vm18_vm0, %v167_v2  ;;  %19 = vst.msk [vmem:[#allocation2] sm:$0xff] %vm18_vm0, %v167_v2 }
   0x2   :  { %147 = vmatprep.subr.mxu0 %v32_v0  ;;  %v30_v3 = vld [vmem:[%s238_s1 + $0x28] sm:$0xff]  ;;  %v23_v4 = vld [vmem:[%s239_s0] sm:$0xff]  ;;  %v28_v6 = vld [vmem:[%s238_s1 + $0x18] sm:$0xff] }
   0x3   :  { %148 = vmatpush3.msra.mxu0 %v32_v0  ;;  %163 = vmatprep.mubr.msk.f32.mxu0 %vm33_vm1, %v23_v4  ;;  %v29_v5 = vld [vmem:[%s238_s1 + $0x20] sm:$0xff]  ;;  %v27_v7 = vld [vmem:[%s238_s1 + $0x10] sm:$0xff]  ;;  %v26_v8 = vld [vmem:[%s238_s1 + $0x8] sm:$0xff] }
   0x4   :  { %149 = vmatprep.subr.mxu0 %v31_v1  ;;  %v25_v9 = vld [vmem:[%s238_s1] sm:$0xff]  ;;  %v24_v10 = vld [vmem:[%s239_s0 + $0x8] sm:$0xff] }
   0x5   :  { %150 = vmatpush3.msra.mxu0 %v31_v1  ;;  %v126_v17 = vld [vmem:[%s240_s2 + $0x8] sm:$0xff]  ;;  %v125_v19 = vld [vmem:[%s240_s2] sm:$0xff] }
   0x6   :  { %151 = vmatprep.subr.mxu0 %v30_v3 }
   0x7   :  { %152 = vmatpush3.msra.mxu0 %v30_v3 }
   0x8   :  { %153 = vmatprep.subr.mxu0 %v29_v5  ;;  %v22_v11 = vld [vmem:[#allocation2 + $0x8] sm:$0xff]  ;;  %v21_v13 = vld [vmem:[#allocation2] sm:$0xff] }
   0x9   :  { %154 = vmatpush3.msra.mxu0 %v29_v5 }
   0xa   :  { %155 = vmatprep.subr.mxu0 %v28_v6 }
   0xb   :  { %156 = vmatpush3.msra.mxu0 %v28_v6 }
   0xc   :  { %157 = vmatprep.subr.mxu0 %v27_v7 }
   0xd   :  { %158 = vmatpush3.msra.mxu0 %v27_v7 }
   0xe   :  { %159 = vmatprep.subr.mxu0 %v26_v8 }
   0xf   :  { %160 = vmatpush3.msra.mxu0 %v26_v8 }
  0x10   :  { %161 = vmatprep.subr.mxu0 %v25_v9 }
  0x11   :  { %162 = vmatpush3.msra.mxu0 %v25_v9 }
  0x12   :  { %164 = vmatmul.mubr.msk.f32.vlgmr.msra.gmra.mxu0 %vm33_vm1, %v24_v10 }
  0xd2   :  { %v165_v12 = vpop.f32.mrf.mxu0 }
  0xd3   :  { %v116_v14 = vadd.f32 %v165_v12, %v22_v11 }
  0xd4   :  { %v106_v15 = vpop.f32.mrf.mxu0 }
  0xd5   :  { %119 = vst.msk [vmem:[#allocation2 + $0x8] sm:$0xff] %vm18_vm0, %v116_v14  ;;  %v115_v16 = vadd.f32 %v106_v15, %v21_v13 }
  0xd7   :  { %118 = vst.msk [vmem:[#allocation2] sm:$0xff] %vm18_vm0, %v115_v16 }
  0xdc   :  { %v124_v18 = vld [vmem:[#allocation2 + $0x8] sm:$0xff] }
  0xdd   :  { %v128_v20 = vadd.f32 %v126_v17, %v124_v18 }
  0xde   :  { %v123_v21 = vld [vmem:[#allocation2] sm:$0xff] }
  0xdf   :  { %130 = vst.msk [vmem:[%s241_s3 + $0x8] sm:$0xff] %vm18_vm0, %v128_v20  ;;  %v127_v22 = vadd.f32 %v125_v19, %v123_v21 }
  0xe1   :  { %129 = vst.msk [vmem:[%s241_s3] sm:$0xff] %vm18_vm0, %v127_v22 }

// kernel: transformer_forward_pallas.21
= control target key start
LH: loop header
LB: loop body
LE: loop exit
PB: predicated region body
PF: predicated region fallthrough
CT: control target
= control target key end

     0   :  { %vm28_vm0 = vcmask 261120   ;;  %s225_s1 = inlined_call_operand.vmem [shape: f32[32,128], index: 1, kind: input, shape index: {}]   ;;  %s226_s0 = inlined_call_operand.vmem [shape: f32[16,32], index: 0, kind: input, shape index: {}]   ;;  %s227_s2 = inlined_call_operand.vmem [shape: f32[1,128], index: 2, kind: input, shape index: {}]   ;;  %s228_s3 = inlined_call_operand.vmem [shape: f32[16,128], index: 3, kind: output, shape index: {}]  }
   0x1   :  { %v27_v0 = vld [vmem:[%s225_s1 + $0x18] sm:$0xff]  ;;  %v26_v1 = vld [vmem:[%s225_s1 + $0x10] sm:$0xff]  ;;  %v22_v2 = vld [vmem:[%s226_s0] sm:$0xff] }
   0x2   :  { %161 = vmatprep.subr.mxu0 %v27_v0  ;;  %v25_v3 = vld [vmem:[%s225_s1 + $0x8] sm:$0xff]  ;;  %169 = vmatprep.mubr.msk.f32.mxu0 %vm28_vm0, %v22_v2  ;;  %v24_v4 = vld [vmem:[%s225_s1] sm:$0xff] }
   0x3   :  { %162 = vmatpush3.msra.mxu0 %v27_v0  ;;  %v23_v5 = vld [vmem:[%s226_s0 + $0x8] sm:$0xff]  ;;  %v154_v6 = vld [vmem:[%s227_s2] ss:$0 sm:$0xff] }
   0x4   :  { %163 = vmatprep.subr.mxu0 %v26_v1 }
   0x5   :  { %164 = vmatpush3.msra.mxu0 %v26_v1 }
   0x6   :  { %165 = vmatprep.subr.mxu0 %v25_v3 }
   0x7   :  { %166 = vmatpush3.msra.mxu0 %v25_v3 }
   0x8   :  { %167 = vmatprep.subr.mxu0 %v24_v4 }
   0x9   :  { %168 = vmatpush3.msra.mxu0 %v24_v4 }
   0xa   :  { %170 = vmatmul.mubr.msk.f32.vlgmr.msra.gmra.mxu0 %vm28_vm0, %v23_v5 }
  0xca   :  { %v171_v7 = vpop.f32.mrf.mxu0 }
  0xcb   :  { %v127_v8 = vadd.f32 %v171_v7, %v154_v6 }
  0xcc   :  { %v101_v9 = vpop.f32.mrf.mxu0 }
  0xcd   :  { %v129_v10 = vmul.f32 %v127_v8, %v127_v8  ;;  %v126_v11 = vadd.f32 %v154_v6, %v101_v9 }
  0xcf   :  { %v131_v12 = vmul.f32 %v129_v10, %v127_v8  ;;  %v128_v13 = vmul.f32 %v126_v11, %v126_v11 }
  0xd1   :  { %v133_v14 = vmul.f32 0.044715, %v131_v12  ;;  %v130_v15 = vmul.f32 %v128_v13, %v126_v11 }
  0xd3   :  { %v135_v16 = vadd.f32 %v133_v14, %v127_v8  ;;  %v132_v17 = vmul.f32 0.044715, %v130_v15 }
  0xd5   :  { %v137_v18 = vmul.f32 0.7978846, %v135_v16  ;;  %v134_v19 = vadd.f32 %v132_v17, %v126_v11 }
  0xd7   :  { %172 = vtanh.f32 %v137_v18  ;;  %v136_v20 = vmul.f32 0.7978846, %v134_v19 }
  0xd9   :  { %174 = vtanh.f32 %v136_v20 }
  0xe4   :  { %v173_v21 = vpop.eup %172 }
  0xe5   :  { %v141_v22 = vadd.f32 1.0, %v173_v21 }
  0xe6   :  { %v175_v23 = vpop.eup %174 }
  0xe7   :  { %v143_v24 = vmul.f32 0.5, %v141_v22  ;;  %v140_v25 = vadd.f32 1.0, %v175_v23 }
  0xe9   :  { %v145_v26 = vmul.f32 %v143_v24, %v127_v8  ;;  %v142_v27 = vmul.f32 0.5, %v140_v25 }
  0xeb   :  { %147 = vst [vmem:[%s228_s3 + $0x8] sm:$0xff] %v145_v26  ;;  %v144_v28 = vmul.f32 %v142_v27, %v126_v11 }
  0xed   :  { %146 = vst [vmem:[%s228_s3] sm:$0xff] %v144_v28 }

// kernel: transformer_forward_pallas.22
= control target key start
LH: loop header
LB: loop body
LE: loop exit
PB: predicated region body
PF: predicated region fallthrough
CT: control target
= control target key end

     0   :  { %vm21_vm0 = vcmask 261120   ;;  %v203_v2 = vmov 0.0   ;;  %s304_s1 = inlined_call_operand.vmem [shape: f32[128,32], index: 1, kind: input, shape index: {}]   ;;  %s305_s0 = inlined_call_operand.vmem [shape: f32[16,128], index: 0, kind: input, shape index: {}]   ;;  %s306_s2 = inlined_call_operand.vmem [shape: f32[1,32], index: 2, kind: input, shape index: {}]   ;;  %s307_s3 = inlined_call_operand.vmem [shape: f32[16,32], index: 3, kind: input, shape index: {}]   ;;  %s308_s4 = inlined_call_operand.vmem [shape: f32[16,32], index: 4, kind: output, shape index: {}]  }
   0x1   :  { %v43_v0 = vld [vmem:[%s304_s1 + $0x78] sm:$0xff]  ;;  %v42_v1 = vld [vmem:[%s304_s1 + $0x70] sm:$0xff]  ;;  %23 = vst.msk [vmem:[#allocation2 + $0x8] sm:$0xff] %vm21_vm0, %v203_v2  ;;  %22 = vst.msk [vmem:[#allocation2] sm:$0xff] %vm21_vm0, %v203_v2 }
   0x2   :  { %167 = vmatprep.subr.mxu0 %v43_v0  ;;  %v41_v3 = vld [vmem:[%s304_s1 + $0x68] sm:$0xff]  ;;  %v40_v4 = vld [vmem:[%s304_s1 + $0x60] sm:$0xff]  ;;  %v39_v6 = vld [vmem:[%s304_s1 + $0x58] sm:$0xff] }
   0x3   :  { %168 = vmatpush3.msra.mxu0 %v43_v0  ;;  %v26_v5 = vld [vmem:[%s305_s0] sm:$0xff]  ;;  %v38_v7 = vld [vmem:[%s304_s1 + $0x50] sm:$0xff]  ;;  %v37_v8 = vld [vmem:[%s304_s1 + $0x48] sm:$0xff] }
   0x4   :  { %169 = vmatprep.subr.mxu0 %v42_v1  ;;  %199 = vmatprep.mubr.f32.mxu0 %v26_v5  ;;  %v36_v9 = vld [vmem:[%s304_s1 + $0x40] sm:$0xff]  ;;  %v35_v10 = vld [vmem:[%s304_s1 + $0x38] sm:$0xff]  ;;  %v34_v11 = vld [vmem:[%s304_s1 + $0x30] sm:$0xff] }
   0x5   :  { %170 = vmatpush3.msra.mxu0 %v42_v1  ;;  %v33_v12 = vld [vmem:[%s304_s1 + $0x28] sm:$0xff]  ;;  %v32_v13 = vld [vmem:[%s304_s1 + $0x20] sm:$0xff]  ;;  %v31_v14 = vld [vmem:[%s304_s1 + $0x18] sm:$0xff] }
   0x6   :  { %171 = vmatprep.subr.mxu0 %v41_v3  ;;  %v30_v15 = vld [vmem:[%s304_s1 + $0x10] sm:$0xff]  ;;  %v29_v16 = vld [vmem:[%s304_s1 + $0x8] sm:$0xff]  ;;  %v28_v17 = vld [vmem:[%s304_s1] sm:$0xff] }
   0x7   :  { %172 = vmatpush3.msra.mxu0 %v41_v3  ;;  %v27_v18 = vld [vmem:[%s305_s0 + $0x8] sm:$0xff]  ;;  %v148_v25 = vld [vmem:[%s306_s2] ss:$0 sm:$0xff] }
   0x8   :  { %173 = vmatprep.subr.mxu0 %v40_v4  ;;  %v25_v19 = vld [vmem:[#allocation2 + $0x8] sm:$0xff]  ;;  %v24_v21 = vld [vmem:[#allocation2] sm:$0xff] }
   0x9   :  { %174 = vmatpush3.msra.mxu0 %v40_v4  ;;  %v139_v27 = vld [vmem:[%s307_s3 + $0x8] sm:$0xff]  ;;  %v138_v29 = vld [vmem:[%s307_s3] sm:$0xff] }
   0xa   :  { %175 = vmatprep.subr.mxu0 %v39_v6 }
   0xb   :  { %176 = vmatpush3.msra.mxu0 %v39_v6 }
   0xc   :  { %177 = vmatprep.subr.mxu0 %v38_v7 }
   0xd   :  { %178 = vmatpush3.msra.mxu0 %v38_v7 }
   0xe   :  { %179 = vmatprep.subr.mxu0 %v37_v8 }
   0xf   :  { %180 = vmatpush3.msra.mxu0 %v37_v8 }
  0x10   :  { %181 = vmatprep.subr.mxu0 %v36_v9 }
  0x11   :  { %182 = vmatpush3.msra.mxu0 %v36_v9 }
  0x12   :  { %183 = vmatprep.subr.mxu0 %v35_v10 }
  0x13   :  { %184 = vmatpush3.msra.mxu0 %v35_v10 }
  0x14   :  { %185 = vmatprep.subr.mxu0 %v34_v11 }
  0x15   :  { %186 = vmatpush3.msra.mxu0 %v34_v11 }
  0x16   :  { %187 = vmatprep.subr.mxu0 %v33_v12 }
  0x17   :  { %188 = vmatpush3.msra.mxu0 %v33_v12 }
  0x18   :  { %189 = vmatprep.subr.mxu0 %v32_v13 }
  0x19   :  { %190 = vmatpush3.msra.mxu0 %v32_v13 }
  0x1a   :  { %191 = vmatprep.subr.mxu0 %v31_v14 }
  0x1b   :  { %192 = vmatpush3.msra.mxu0 %v31_v14 }
  0x1c   :  { %193 = vmatprep.subr.mxu0 %v30_v15 }
  0x1d   :  { %194 = vmatpush3.msra.mxu0 %v30_v15 }
  0x1e   :  { %195 = vmatprep.subr.mxu0 %v29_v16 }
  0x1f   :  { %196 = vmatpush3.msra.mxu0 %v29_v16 }
  0x20   :  { %197 = vmatprep.subr.mxu0 %v28_v17 }
  0x21   :  { %198 = vmatpush3.msra.mxu0 %v28_v17 }
  0x22   :  { %200 = vmatmul.mubr.f32.vlgmr.msra.gmra.mxu0 %v27_v18 }
  0xe2   :  { %v201_v20 = vpop.f32.mrf.mxu0 }
  0xe3   :  { %v120_v22 = vadd.f32 %v201_v20, %v25_v19 }
  0xe4   :  { %v110_v23 = vpop.f32.mrf.mxu0 }
  0xe5   :  { %123 = vst.msk [vmem:[#allocation2 + $0x8] sm:$0xff] %vm21_vm0, %v120_v22  ;;  %v119_v24 = vadd.f32 %v110_v23, %v24_v21 }
  0xe7   :  { %122 = vst.msk [vmem:[#allocation2] sm:$0xff] %vm21_vm0, %v119_v24 }
  0xec   :  { %v128_v26 = vld [vmem:[#allocation2 + $0x8] sm:$0xff] }
  0xed   :  { %v137_v28 = vadd.f32 %v148_v25, %v128_v26 }
  0xee   :  { %v127_v30 = vld [vmem:[#allocation2] sm:$0xff] }
  0xef   :  { %v141_v31 = vadd.f32 %v139_v27, %v137_v28  ;;  %v136_v32 = vadd.f32 %v148_v25, %v127_v30 }
  0xf1   :  { %143 = vst.msk [vmem:[%s308_s4 + $0x8] sm:$0xff] %vm21_vm0, %v141_v31  ;;  %v140_v33 = vadd.f32 %v138_v29, %v136_v32 }
  0xf3   :  { %142 = vst.msk [vmem:[%s308_s4] sm:$0xff] %vm21_vm0, %v140_v33 }

// kernel: transformer_forward_pallas.31
= control target key start
LH: loop header
LB: loop body
LE: loop exit
PB: predicated region body
PF: predicated region fallthrough
CT: control target
= control target key end

     0   :  { %s241_s0 = inlined_call_operand.vmem [shape: f32[16,32], index: 0, kind: input, shape index: {}]   ;;  %s242_s1 = inlined_call_operand.vmem [shape: f32[32,256], index: 1, kind: input, shape index: {}]   ;;  %s243_s2 = inlined_call_operand.hbm [shape: f32[16,256], index: 2, kind: output, shape index: {}]  }
   0x1   :  { %v33_v0 = vld [vmem:[%s242_s1 + $0x38] sm:$0xff]  ;;  %v32_v1 = vld [vmem:[%s242_s1 + $0x30] sm:$0xff]  ;;  %v31_v2 = vld [vmem:[%s242_s1 + $0x28] sm:$0xff] }
   0x2   :  { %65 = vmatprep.subr.mxu0 %v33_v0  ;;  %155 = vmatprep.subr.mxu1 %v33_v0  ;;  %v30_v3 = vld [vmem:[%s242_s1 + $0x20] sm:$0xff]  ;;  %v29_v4 = vld [vmem:[%s242_s1 + $0x18] sm:$0xff]  ;;  %v28_v5 = vld [vmem:[%s242_s1 + $0x10] sm:$0xff] }
   0x3   :  { %66 = vmatpush1.msra.mxu0 %v32_v1  ;;  %159 = vmatpush1.msra.mxu1 %v32_v1 }
   0x4   :  { %67 = vmatprep.subr.mxu0 %v31_v2  ;;  %156 = vmatprep.subr.mxu1 %v31_v2 }
   0x5   :  { %7 = vsyncpa [#allocation4], 0  ;;  %68 = vmatpush1.msra.mxu0 %v30_v3  ;;  %160 = vmatpush1.msra.mxu1 %v30_v3  ;;  %v27_v6 = vld [vmem:[%s242_s1 + $0x8] sm:$0xff]  ;;  %v26_v7 = vld [vmem:[%s242_s1] sm:$0xff]  ;;  %vm34_vm0 = vcmask 261120   ;;  %v189_v10 = vmov 0.0  }
   0x6   :  { %69 = vmatprep.subr.mxu0 %v29_v4  ;;  %157 = vmatprep.subr.mxu1 %v29_v4  ;;  %v24_v8 = vld [vmem:[%s241_s0] sm:$0xff]  ;;  %v25_v9 = vld [vmem:[%s241_s0 + $0x8] sm:$0xff]  ;;  %s190_s1 = smov [#allocation3]  }
   0x7   :  { %70 = vmatpush1.msra.mxu0 %v28_v5  ;;  %161 = vmatpush1.msra.mxu1 %v28_v5  ;;  %s142_s29 = sshll.u32 %s190_s1, 4  ;;  %s143_s29 = int_to_ptr.vmem [resolvable:$true] %s142_s29 }
   0x8   :  { %71 = vmatprep.subr.mxu0 %v27_v6  ;;  %158 = vmatprep.subr.mxu1 %v27_v6  ;;  %s167_s30 = scalar_lea.vmem %s143_s29, 512  ;;  %p172_p1 = scmp.lt.s32.totalorder %s143_s29, %s143_s29 }
   0x9   :  { %72 = vmatpush1.msra.mxu0 %v26_v7  ;;  %162 = vmatpush1.msra.mxu1 %v26_v7  ;;  %p168_p0 = scmp.ne.s32.totalorder %s143_s29, %s167_s30  ;;  %p173_p2 = scmp.lt.s32.totalorder %s167_s30, %s167_s30 }
   0xa   :  { %105 = vmatprep.mubr.f32.mxu0 %v189_v10  ;;  %111 = vmatprep.mubr.f32.mxu1 %v189_v10 }
   0xb   :  { %153 = vmatmul.mubr.msk.f32.vlgmr.msra.gmra.mxu0 %vm34_vm0, %v24_v8  ;;  %154 = vmatmul.mubr.msk.f32.vlgmr.msra.gmra.mxu1 %vm34_vm0, %v25_v9  ;;  %p174_p3 = por %p173_p2, %p172_p1 }
   0xd   :  { %p175_p4 = pnand %p174_p3, %p168_p0 }
  0xcb   :  { %v107_v11 = vpop.f32.mrf.mxu0  ;;  %v113_v12 = vpop.f32.mrf.mxu1 }
  0xcc   :  { %133 = vst [vmem:[#allocation3] sm:$0xff] %v107_v11  ;;  %135 = vst [vmem:[#allocation3 + $0x10] sm:$0xff] %v113_v12 }
  0xcd   :  { %v109_v13 = vpop.f32.mrf.mxu0  ;;  %v115_v14 = vpop.f32.mrf.mxu1 }
  0xce   :  { %134 = vst [vmem:[#allocation3 + $0x8] sm:$0xff] %v109_v13  ;;  %136 = vst [vmem:[#allocation3 + $0x18] sm:$0xff] %v115_v14 }
  0xcf   :  { %178 = shalt.err (!%p175_p4)
}
  0xd0   :  { %s191_s0 = smov 256   ;;  %s192_s3 = smov 16  }
  0xd1   :  { %148 = dma.vmem_to_hbm [thread:$0]  %s143_s29, 512, %s243_s2, [#allocation4], %s191_s0, %s191_s0, %s192_s3  }
  0xd2   :  { %187 = dma.done.wait [#allocation4], 512  }
  0xd3   :  { %188 = vsyncadd [#allocation4], 4294966784 }
  0xd4   :  { %152 = vsyncpa [#allocation4], 1 }

</bundles_post_ra>
